<compile_context>
chip_gen: v7x
topology: tpu7x:2x2x1
jax: 0.10.0
libtpu: 0.0.40
codegen_flags: <defaults>
</compile_context>

<pallas_src>
import jax
import jax.numpy as jnp
from jax.experimental import pallas as pl
from jax.experimental.pallas import tpu as pltpu


# -----------------------------------------------------------------------------
# Fused Pallas kernel: L stacked LSTM layers + Linear head, single invocation.
# -----------------------------------------------------------------------------
def _make_fused_lstm_kernel(L, T, B, H):
    """Build the fused kernel.

    Positional refs:
      inputs : x_flat (T*B, D) time-major,
               [W_ih^T (Din,4H), W_hh^T (H,4H), bias (1,4H)] * L,
               h0 (L,B,H), c0 (L,B,H), W_lin^T (H,O), b_lin (1,O)
      output : pred (B, O)
      scratch: xw_sc (T*B, 4H) f32   -- batched gate pre-activations
               hseq_sc (T*B, H) f32  -- inter-layer hidden sequence (VMEM only)
    """

    def kernel(*refs):
        x_ref = refs[0]
        layer_w = [(refs[1 + 3 * l], refs[2 + 3 * l], refs[3 + 3 * l])
                   for l in range(L)]
        h0_ref = refs[1 + 3 * L]
        c0_ref = refs[2 + 3 * L]
        wlin_ref = refs[3 + 3 * L]
        blin_ref = refs[4 + 3 * L]
        out_ref = refs[5 + 3 * L]
        xw_sc = refs[6 + 3 * L]
        hseq_sc = refs[7 + 3 * L]

        h = None
        for l, (wih_ref, whh_ref, b_ref) in enumerate(layer_w):
            # Layer input: original sequence for layer 0, previous layer's
            # hidden sequence (already resident in VMEM scratch) afterwards.
            layer_in = x_ref[...] if l == 0 else hseq_sc[...]

            # (1) Batched input projection for the whole sequence:
            #     ONE matmul, off the recurrence critical chain.
            xw_sc[...] = (
                jnp.dot(layer_in, wih_ref[...],
                        preferred_element_type=jnp.float32)
                + b_ref[...])

            whh = whh_ref[...]
            h = h0_ref[l]
            c = c0_ref[l]
            last_layer = (l == L - 1)

            # (2) Serial recurrence, fully unrolled (T small & static): the
            #     per-step body is only h @ W_hh^T plus element-wise gate math.
            for t in range(T):
                r0 = t * B
                gates = (xw_sc[r0:r0 + B, :]
                         + jnp.dot(h, whh,
                                   preferred_element_type=jnp.float32))
                # PyTorch gate order: i, f, g, o.
                i_g = jax.nn.sigmoid(gates[:, 0 * H:1 * H])
                f_g = jax.nn.sigmoid(gates[:, 1 * H:2 * H])
                g_g = jnp.tanh(gates[:, 2 * H:3 * H])
                o_g = jax.nn.sigmoid(gates[:, 3 * H:4 * H])
                c = f_g * c + i_g * g_g
                h = o_g * jnp.tanh(c)
                if not last_layer:
                    hseq_sc[r0:r0 + B, :] = h   # feed next layer; stays in VMEM

        # (3) Linear head on the last timestep of the last layer.
        out_ref[...] = (
            jnp.dot(h, wlin_ref[...], preferred_element_type=jnp.float32)
            + blin_ref[...]).astype(out_ref.dtype)

    return kernel


# -----------------------------------------------------------------------------
# Wrapper
# -----------------------------------------------------------------------------
def fused_forward(x_btd, lstm_params, h0, c0, w_lin_t, b_lin):
    B, T, D = x_btd.shape
    L = len(lstm_params)
    H = h0.shape[-1]
    O = w_lin_t.shape[-1]

    # Layout plumbing only: (B,T,D) -> time-major flat (T*B, D), 4 KiB copy.
    x_flat = jnp.transpose(x_btd, (1, 0, 2)).reshape(T * B, D)

    flat_w = []
    for (wih_t, whh_t, bias) in lstm_params:
        flat_w += [wih_t, whh_t, bias]
    inputs = [x_flat] + flat_w + [h0, c0, w_lin_t, b_lin]

    def full_spec(a):
        nd = len(a.shape)
        return pl.BlockSpec(a.shape, lambda i, _nd=nd: (0,) * _nd)

    kernel = _make_fused_lstm_kernel(L, T, B, H)
    pred = pl.pallas_call(
        kernel,
        out_shape=jax.ShapeDtypeStruct((B, O), jnp.float32),
        grid_spec=pltpu.PrefetchScalarGridSpec(
            num_scalar_prefetch=0,
            grid=(1,),                 # single invocation; time loop is in-kernel
            in_specs=[full_spec(a) for a in inputs],
            out_specs=pl.BlockSpec((B, O), lambda i: (0, 0)),
            scratch_shapes=[
                pltpu.VMEM((T * B, 4 * H), jnp.float32),
                pltpu.VMEM((T * B, H), jnp.float32),
            ],
        ),
        compiler_params=pltpu.CompilerParams(
            dimension_semantics=("arbitrary",)),
    )(*inputs)
    return pred


@jax.jit
def model_forward(x_btd, lstm_params, h0, c0, w_lin_t, b_lin):
    """Equivalent of Model.forward: stacked LSTM + linear on last timestep."""
    pred = fused_forward(x_btd, lstm_params, h0, c0, w_lin_t, b_lin)
    return pred[:, :, None]                       # (B, output_len, 1)


# -----------------------------------------------------------------------------
# Pure-JAX reference (for sanity check)
# -----------------------------------------------------------------------------
def reference_forward(x_btd, lstm_params, h0, c0, w_lin_t, b_lin):
    out = x_btd
    for l, (wih_t, whh_t, bias) in enumerate(lstm_params):
        H = h0.shape[-1]

        def step(carry, xt, wih_t=wih_t, whh_t=whh_t, bias=bias, H=H):
            h, c = carry
            g = xt @ wih_t + h @ whh_t + bias[0]
            i = jax.nn.sigmoid(g[:, 0 * H:1 * H])
            f = jax.nn.sigmoid(g[:, 1 * H:2 * H])
            gg = jnp.tanh(g[:, 2 * H:3 * H])
            o = jax.nn.sigmoid(g[:, 3 * H:4 * H])
            c = f * c + i * gg
            h = o * jnp.tanh(c)
            return (h, c), h

        _, hs = jax.lax.scan(step, (h0[l], c0[l]),
                             jnp.transpose(out, (1, 0, 2)))
        out = jnp.transpose(hs, (1, 0, 2))
    pred = out[:, -1, :] @ w_lin_t + b_lin
    return pred[:, :, None]


# -----------------------------------------------------------------------------
# Main
# -----------------------------------------------------------------------------
if __name__ == "__main__":
    # config (small shapes consistent with the module)
    batch_size = 4
    input_len = 8          # sequence length T
    enc_in = 32            # input_size == hidden_layer_size == enc_in
    output_len = 4
    layer_num = 2

    B, T, D, H, O, L = batch_size, input_len, enc_in, enc_in, output_len, layer_num

    key = jax.random.PRNGKey(0)
    keys = jax.random.split(key, 4 * L + 5)
    k = 1.0 / jnp.sqrt(jnp.float32(H))   # PyTorch default uniform(-1/sqrt(H), 1/sqrt(H))

    # LSTM parameters per layer (already transposed for x @ W^T form).
    lstm_params = []
    for l in range(L):
        in_dim = D if l == 0 else H
        wih_t = jax.random.uniform(keys[4 * l + 0], (in_dim, 4 * H),
                                   jnp.float32, -k, k)
        whh_t = jax.random.uniform(keys[4 * l + 1], (H, 4 * H),
                                   jnp.float32, -k, k)
        b_ih = jax.random.uniform(keys[4 * l + 2], (4 * H,), jnp.float32, -k, k)
        b_hh = jax.random.uniform(keys[4 * l + 3], (4 * H,), jnp.float32, -k, k)
        bias = (b_ih + b_hh).reshape(1, 4 * H)
        lstm_params.append((wih_t, whh_t, bias))

    # Linear head.
    w_lin_t = jax.random.uniform(keys[4 * L + 0], (H, O), jnp.float32, -k, k)
    b_lin = jax.random.uniform(keys[4 * L + 1], (1, O), jnp.float32, -k, k)

    # Initial hidden/cell state (stands in for xavier_uniform init in __init__).
    xav = jnp.sqrt(6.0 / (B * H + H))
    h0 = jax.random.uniform(keys[4 * L + 2], (L, B, H), jnp.float32, -xav, xav)
    c0 = jax.random.uniform(keys[4 * L + 3], (L, B, H), jnp.float32, -xav, xav)

    # Input x: (batch, input_len, enc_in) — batch_first like the PyTorch module.
    x = jax.random.normal(keys[4 * L + 4], (B, T, D), jnp.float32)

    pred = model_forward(x, lstm_params, h0, c0, w_lin_t, b_lin)
    pred = jax.block_until_ready(pred)

    assert pred.shape == (B, O, 1), pred.shape

    ref = reference_forward(x, lstm_params, h0, c0, w_lin_t, b_lin)
    assert jnp.allclose(pred, ref, atol=1e-5, rtol=1e-5), \
        float(jnp.max(jnp.abs(pred - ref)))

    print("KERNEL_OK")
</pallas_src>

<mosaic_0001>
module attributes {stable_mosaic.version = 11 : i64} {
  func.func @kernel(%arg0: i32, %arg1: memref<32x32xf32, #tpu.memory_space<vmem>>, %arg2: memref<32x128xf32, #tpu.memory_space<vmem>>, %arg3: memref<32x128xf32, #tpu.memory_space<vmem>>, %arg4: memref<1x128xf32, #tpu.memory_space<vmem>>, %arg5: memref<32x128xf32, #tpu.memory_space<vmem>>, %arg6: memref<32x128xf32, #tpu.memory_space<vmem>>, %arg7: memref<1x128xf32, #tpu.memory_space<vmem>>, %arg8: memref<2x4x32xf32, #tpu.memory_space<vmem>>, %arg9: memref<2x4x32xf32, #tpu.memory_space<vmem>>, %arg10: memref<32x4xf32, #tpu.memory_space<vmem>>, %arg11: memref<1x4xf32, #tpu.memory_space<vmem>>, %arg12: memref<4x4xf32, #tpu.memory_space<vmem>>, %arg13: memref<32x128xf32, #tpu.memory_space<vmem>>, %arg14: memref<32x32xf32, #tpu.memory_space<vmem>>) attributes {dimension_semantics = [#tpu.dimension_semantics<arbitrary>], iteration_bounds = array<i64: 1>, scalar_prefetch = 0 : i64, scratch_operands = 2 : i64, tpu.core_type = #tpu.core_type<tc>, window_params = [{pipeline_mode = #tpu.pipeline_mode<synchronous>, transform_indices = @transform_0, window_bounds = array<i64: 32, 32>}, {pipeline_mode = #tpu.pipeline_mode<synchronous>, transform_indices = @transform_1, window_bounds = array<i64: 32, 128>}, {pipeline_mode = #tpu.pipeline_mode<synchronous>, transform_indices = @transform_2, window_bounds = array<i64: 32, 128>}, {pipeline_mode = #tpu.pipeline_mode<synchronous>, transform_indices = @transform_3, window_bounds = array<i64: 1, 128>}, {pipeline_mode = #tpu.pipeline_mode<synchronous>, transform_indices = @transform_4, window_bounds = array<i64: 32, 128>}, {pipeline_mode = #tpu.pipeline_mode<synchronous>, transform_indices = @transform_5, window_bounds = array<i64: 32, 128>}, {pipeline_mode = #tpu.pipeline_mode<synchronous>, transform_indices = @transform_6, window_bounds = array<i64: 1, 128>}, {pipeline_mode = #tpu.pipeline_mode<synchronous>, transform_indices = @transform_7, window_bounds = array<i64: 2, 4, 32>}, {pipeline_mode = #tpu.pipeline_mode<synchronous>, transform_indices = @transform_8, window_bounds = array<i64: 2, 4, 32>}, {pipeline_mode = #tpu.pipeline_mode<synchronous>, transform_indices = @transform_9, window_bounds = array<i64: 32, 4>}, {pipeline_mode = #tpu.pipeline_mode<synchronous>, transform_indices = @transform_10, window_bounds = array<i64: 1, 4>}, {pipeline_mode = #tpu.pipeline_mode<synchronous>, transform_indices = @transform_11, window_bounds = array<i64: 4, 4>}]} {
    %c0 = arith.constant 0 : index
    %c0_0 = arith.constant 0 : index
    %0 = vector.load %arg1[%c0, %c0_0] : memref<32x32xf32, #tpu.memory_space<vmem>>, vector<32x32xf32>
    %c0_1 = arith.constant 0 : index
    %c0_2 = arith.constant 0 : index
    %1 = vector.load %arg2[%c0_1, %c0_2] : memref<32x128xf32, #tpu.memory_space<vmem>>, vector<32x128xf32>
    %cst = arith.constant dense<0.000000e+00> : vector<32x128xf32>
    %2 = tpu.matmul %0, %1, %cst {dimension_numbers = #tpu.dot_dimension_numbers<[1], [0], [0], [1], [0, 0, 1, 1], [], []>} : vector<32x32xf32>, vector<32x128xf32>, vector<32x128xf32> -> vector<32x128xf32>
    %c0_3 = arith.constant 0 : index
    %c0_4 = arith.constant 0 : index
    %3 = vector.load %arg4[%c0_3, %c0_4] : memref<1x128xf32, #tpu.memory_space<vmem>>, vector<1x128xf32>
    %4 = vector.broadcast %3 : vector<1x128xf32> to vector<32x128xf32>
    %5 = arith.addf %2, %4 : vector<32x128xf32>
    %c0_5 = arith.constant 0 : index
    %c0_6 = arith.constant 0 : index
    %6 = vector.load %arg13[%c0_5, %c0_6] : memref<32x128xf32, #tpu.memory_space<vmem>>, vector<32x128xf32>
    tpu.vector_store %arg13[%c0_5, %c0_6], %5 {strides = array<i32>} : memref<32x128xf32, #tpu.memory_space<vmem>>, vector<32x128xf32>,
    %c0_7 = arith.constant 0 : index
    %c0_8 = arith.constant 0 : index
    %7 = vector.load %arg3[%c0_7, %c0_8] : memref<32x128xf32, #tpu.memory_space<vmem>>, vector<32x128xf32>
    %c0_9 = arith.constant 0 : index
    %c0_10 = arith.constant 0 : index
    %c0_11 = arith.constant 0 : index
    %8 = vector.load %arg8[%c0_9, %c0_10, %c0_11] : memref<2x4x32xf32, #tpu.memory_space<vmem>>, vector<1x4x32xf32>
    %9 = vector.shape_cast %8 : vector<1x4x32xf32> to vector<4x32xf32>
    %c0_12 = arith.constant 0 : index
    %c0_13 = arith.constant 0 : index
    %c0_14 = arith.constant 0 : index
    %10 = vector.load %arg9[%c0_12, %c0_13, %c0_14] : memref<2x4x32xf32, #tpu.memory_space<vmem>>, vector<1x4x32xf32>
    %11 = vector.shape_cast %10 : vector<1x4x32xf32> to vector<4x32xf32>
    %c0_15 = arith.constant 0 : index
    %c0_16 = arith.constant 0 : index
    %12 = vector.load %arg13[%c0_15, %c0_16] : memref<32x128xf32, #tpu.memory_space<vmem>>, vector<4x128xf32>
    %cst_17 = arith.constant dense<0.000000e+00> : vector<4x128xf32>
    %13 = tpu.matmul %9, %7, %cst_17 {dimension_numbers = #tpu.dot_dimension_numbers<[1], [0], [0], [1], [0, 0, 1, 1], [], []>} : vector<4x32xf32>, vector<32x128xf32>, vector<4x128xf32> -> vector<4x128xf32>
    %14 = arith.addf %12, %13 : vector<4x128xf32>
    %15 = vector.extract_strided_slice %14 {offsets = [0, 0], sizes = [4, 32], strides = [1, 1]} : vector<4x128xf32> to vector<4x32xf32>
    %16 = arith.negf %15 : vector<4x32xf32>
    %17 = math.exp %16 : vector<4x32xf32>
    %cst_18 = arith.constant 1.000000e+00 : f32
    %18 = vector.broadcast %cst_18 : f32 to vector<4x32xf32>
    %19 = arith.addf %18, %17 : vector<4x32xf32>
    %20 = arith.divf %18, %19 : vector<4x32xf32>
    %21 = vector.extract_strided_slice %14 {offsets = [0, 32], sizes = [4, 32], strides = [1, 1]} : vector<4x128xf32> to vector<4x32xf32>
    %22 = arith.negf %21 : vector<4x32xf32>
    %23 = math.exp %22 : vector<4x32xf32>
    %cst_19 = arith.constant 1.000000e+00 : f32
    %24 = vector.broadcast %cst_19 : f32 to vector<4x32xf32>
    %25 = arith.addf %24, %23 : vector<4x32xf32>
    %26 = arith.divf %24, %25 : vector<4x32xf32>
    %27 = vector.extract_strided_slice %14 {offsets = [0, 64], sizes = [4, 32], strides = [1, 1]} : vector<4x128xf32> to vector<4x32xf32>
    %28 = math.tanh %27 : vector<4x32xf32>
    %29 = vector.extract_strided_slice %14 {offsets = [0, 96], sizes = [4, 32], strides = [1, 1]} : vector<4x128xf32> to vector<4x32xf32>
    %30 = arith.negf %29 : vector<4x32xf32>
    %31 = math.exp %30 : vector<4x32xf32>
    %cst_20 = arith.constant 1.000000e+00 : f32
    %32 = vector.broadcast %cst_20 : f32 to vector<4x32xf32>
    %33 = arith.addf %32, %31 : vector<4x32xf32>
    %34 = arith.divf %32, %33 : vector<4x32xf32>
    %35 = arith.mulf %26, %11 : vector<4x32xf32>
    %36 = arith.mulf %20, %28 : vector<4x32xf32>
    %37 = arith.addf %35, %36 : vector<4x32xf32>
    %38 = math.tanh %37 : vector<4x32xf32>
    %39 = arith.mulf %34, %38 : vector<4x32xf32>
    %c0_21 = arith.constant 0 : index
    %c0_22 = arith.constant 0 : index
    %40 = vector.load %arg14[%c0_21, %c0_22] : memref<32x32xf32, #tpu.memory_space<vmem>>, vector<4x32xf32>
    tpu.vector_store %arg14[%c0_21, %c0_22], %39 {strides = array<i32>} : memref<32x32xf32, #tpu.memory_space<vmem>>, vector<4x32xf32>,
    %c4 = arith.constant 4 : index
    %c0_23 = arith.constant 0 : index
    %41 = vector.load %arg13[%c4, %c0_23] : memref<32x128xf32, #tpu.memory_space<vmem>>, vector<4x128xf32>
    %cst_24 = arith.constant dense<0.000000e+00> : vector<4x128xf32>
    %42 = tpu.matmul %39, %7, %cst_24 {dimension_numbers = #tpu.dot_dimension_numbers<[1], [0], [0], [1], [0, 0, 1, 1], [], []>} : vector<4x32xf32>, vector<32x128xf32>, vector<4x128xf32> -> vector<4x128xf32>
    %43 = arith.addf %41, %42 : vector<4x128xf32>
    %44 = vector.extract_strided_slice %43 {offsets = [0, 0], sizes = [4, 32], strides = [1, 1]} : vector<4x128xf32> to vector<4x32xf32>
    %45 = arith.negf %44 : vector<4x32xf32>
    %46 = math.exp %45 : vector<4x32xf32>
    %cst_25 = arith.constant 1.000000e+00 : f32
    %47 = vector.broadcast %cst_25 : f32 to vector<4x32xf32>
    %48 = arith.addf %47, %46 : vector<4x32xf32>
    %49 = arith.divf %47, %48 : vector<4x32xf32>
    %50 = vector.extract_strided_slice %43 {offsets = [0, 32], sizes = [4, 32], strides = [1, 1]} : vector<4x128xf32> to vector<4x32xf32>
    %51 = arith.negf %50 : vector<4x32xf32>
    %52 = math.exp %51 : vector<4x32xf32>
    %cst_26 = arith.constant 1.000000e+00 : f32
    %53 = vector.broadcast %cst_26 : f32 to vector<4x32xf32>
    %54 = arith.addf %53, %52 : vector<4x32xf32>
    %55 = arith.divf %53, %54 : vector<4x32xf32>
    %56 = vector.extract_strided_slice %43 {offsets = [0, 64], sizes = [4, 32], strides = [1, 1]} : vector<4x128xf32> to vector<4x32xf32>
    %57 = math.tanh %56 : vector<4x32xf32>
    %58 = vector.extract_strided_slice %43 {offsets = [0, 96], sizes = [4, 32], strides = [1, 1]} : vector<4x128xf32> to vector<4x32xf32>
    %59 = arith.negf %58 : vector<4x32xf32>
    %60 = math.exp %59 : vector<4x32xf32>
    %cst_27 = arith.constant 1.000000e+00 : f32
    %61 = vector.broadcast %cst_27 : f32 to vector<4x32xf32>
    %62 = arith.addf %61, %60 : vector<4x32xf32>
    %63 = arith.divf %61, %62 : vector<4x32xf32>
    %64 = arith.mulf %55, %37 : vector<4x32xf32>
    %65 = arith.mulf %49, %57 : vector<4x32xf32>
    %66 = arith.addf %64, %65 : vector<4x32xf32>
    %67 = math.tanh %66 : vector<4x32xf32>
    %68 = arith.mulf %63, %67 : vector<4x32xf32>
    %c4_28 = arith.constant 4 : index
    %c0_29 = arith.constant 0 : index
    %69 = vector.load %arg14[%c4_28, %c0_29] : memref<32x32xf32, #tpu.memory_space<vmem>>, vector<4x32xf32>
    tpu.vector_store %arg14[%c4_28, %c0_29], %68 {strides = array<i32>} : memref<32x32xf32, #tpu.memory_space<vmem>>, vector<4x32xf32>,
    %c8 = arith.constant 8 : index
    %c0_30 = arith.constant 0 : index
    %70 = vector.load %arg13[%c8, %c0_30] : memref<32x128xf32, #tpu.memory_space<vmem>>, vector<4x128xf32>
    %cst_31 = arith.constant dense<0.000000e+00> : vector<4x128xf32>
    %71 = tpu.matmul %68, %7, %cst_31 {dimension_numbers = #tpu.dot_dimension_numbers<[1], [0], [0], [1], [0, 0, 1, 1], [], []>} : vector<4x32xf32>, vector<32x128xf32>, vector<4x128xf32> -> vector<4x128xf32>
    %72 = arith.addf %70, %71 : vector<4x128xf32>
    %73 = vector.extract_strided_slice %72 {offsets = [0, 0], sizes = [4, 32], strides = [1, 1]} : vector<4x128xf32> to vector<4x32xf32>
    %74 = arith.negf %73 : vector<4x32xf32>
    %75 = math.exp %74 : vector<4x32xf32>
    %cst_32 = arith.constant 1.000000e+00 : f32
    %76 = vector.broadcast %cst_32 : f32 to vector<4x32xf32>
    %77 = arith.addf %76, %75 : vector<4x32xf32>
    %78 = arith.divf %76, %77 : vector<4x32xf32>
    %79 = vector.extract_strided_slice %72 {offsets = [0, 32], sizes = [4, 32], strides = [1, 1]} : vector<4x128xf32> to vector<4x32xf32>
    %80 = arith.negf %79 : vector<4x32xf32>
    %81 = math.exp %80 : vector<4x32xf32>
    %cst_33 = arith.constant 1.000000e+00 : f32
    %82 = vector.broadcast %cst_33 : f32 to vector<4x32xf32>
    %83 = arith.addf %82, %81 : vector<4x32xf32>
    %84 = arith.divf %82, %83 : vector<4x32xf32>
    %85 = vector.extract_strided_slice %72 {offsets = [0, 64], sizes = [4, 32], strides = [1, 1]} : vector<4x128xf32> to vector<4x32xf32>
    %86 = math.tanh %85 : vector<4x32xf32>
    %87 = vector.extract_strided_slice %72 {offsets = [0, 96], sizes = [4, 32], strides = [1, 1]} : vector<4x128xf32> to vector<4x32xf32>
    %88 = arith.negf %87 : vector<4x32xf32>
    %89 = math.exp %88 : vector<4x32xf32>
    %cst_34 = arith.constant 1.000000e+00 : f32
    %90 = vector.broadcast %cst_34 : f32 to vector<4x32xf32>
    %91 = arith.addf %90, %89 : vector<4x32xf32>
    %92 = arith.divf %90, %91 : vector<4x32xf32>
    %93 = arith.mulf %84, %66 : vector<4x32xf32>
    %94 = arith.mulf %78, %86 : vector<4x32xf32>
    %95 = arith.addf %93, %94 : vector<4x32xf32>
    %96 = math.tanh %95 : vector<4x32xf32>
    %97 = arith.mulf %92, %96 : vector<4x32xf32>
    %c8_35 = arith.constant 8 : index
    %c0_36 = arith.constant 0 : index
    %98 = vector.load %arg14[%c8_35, %c0_36] : memref<32x32xf32, #tpu.memory_space<vmem>>, vector<4x32xf32>
    tpu.vector_store %arg14[%c8_35, %c0_36], %97 {strides = array<i32>} : memref<32x32xf32, #tpu.memory_space<vmem>>, vector<4x32xf32>,
    %c12 = arith.constant 12 : index
    %c0_37 = arith.constant 0 : index
    %99 = vector.load %arg13[%c12, %c0_37] : memref<32x128xf32, #tpu.memory_space<vmem>>, vector<4x128xf32>
    %cst_38 = arith.constant dense<0.000000e+00> : vector<4x128xf32>
    %100 = tpu.matmul %97, %7, %cst_38 {dimension_numbers = #tpu.dot_dimension_numbers<[1], [0], [0], [1], [0, 0, 1, 1], [], []>} : vector<4x32xf32>, vector<32x128xf32>, vector<4x128xf32> -> vector<4x128xf32>
    %101 = arith.addf %99, %100 : vector<4x128xf32>
    %102 = vector.extract_strided_slice %101 {offsets = [0, 0], sizes = [4, 32], strides = [1, 1]} : vector<4x128xf32> to vector<4x32xf32>
    %103 = arith.negf %102 : vector<4x32xf32>
    %104 = math.exp %103 : vector<4x32xf32>
    %cst_39 = arith.constant 1.000000e+00 : f32
    %105 = vector.broadcast %cst_39 : f32 to vector<4x32xf32>
    %106 = arith.addf %105, %104 : vector<4x32xf32>
    %107 = arith.divf %105, %106 : vector<4x32xf32>
    %108 = vector.extract_strided_slice %101 {offsets = [0, 32], sizes = [4, 32], strides = [1, 1]} : vector<4x128xf32> to vector<4x32xf32>
    %109 = arith.negf %108 : vector<4x32xf32>
    %110 = math.exp %109 : vector<4x32xf32>
    %cst_40 = arith.constant 1.000000e+00 : f32
    %111 = vector.broadcast %cst_40 : f32 to vector<4x32xf32>
    %112 = arith.addf %111, %110 : vector<4x32xf32>
    %113 = arith.divf %111, %112 : vector<4x32xf32>
    %114 = vector.extract_strided_slice %101 {offsets = [0, 64], sizes = [4, 32], strides = [1, 1]} : vector<4x128xf32> to vector<4x32xf32>
    %115 = math.tanh %114 : vector<4x32xf32>
    %116 = vector.extract_strided_slice %101 {offsets = [0, 96], sizes = [4, 32], strides = [1, 1]} : vector<4x128xf32> to vector<4x32xf32>
    %117 = arith.negf %116 : vector<4x32xf32>
    %118 = math.exp %117 : vector<4x32xf32>
    %cst_41 = arith.constant 1.000000e+00 : f32
    %119 = vector.broadcast %cst_41 : f32 to vector<4x32xf32>
    %120 = arith.addf %119, %118 : vector<4x32xf32>
    %121 = arith.divf %119, %120 : vector<4x32xf32>
    %122 = arith.mulf %113, %95 : vector<4x32xf32>
    %123 = arith.mulf %107, %115 : vector<4x32xf32>
    %124 = arith.addf %122, %123 : vector<4x32xf32>
    %125 = math.tanh %124 : vector<4x32xf32>
    %126 = arith.mulf %121, %125 : vector<4x32xf32>
    %c12_42 = arith.constant 12 : index
    %c0_43 = arith.constant 0 : index
    %127 = vector.load %arg14[%c12_42, %c0_43] : memref<32x32xf32, #tpu.memory_space<vmem>>, vector<4x32xf32>
    tpu.vector_store %arg14[%c12_42, %c0_43], %126 {strides = array<i32>} : memref<32x32xf32, #tpu.memory_space<vmem>>, vector<4x32xf32>,
    %c16 = arith.constant 16 : index
    %c0_44 = arith.constant 0 : index
    %128 = vector.load %arg13[%c16, %c0_44] : memref<32x128xf32, #tpu.memory_space<vmem>>, vector<4x128xf32>
    %cst_45 = arith.constant dense<0.000000e+00> : vector<4x128xf32>
    %129 = tpu.matmul %126, %7, %cst_45 {dimension_numbers = #tpu.dot_dimension_numbers<[1], [0], [0], [1], [0, 0, 1, 1], [], []>} : vector<4x32xf32>, vector<32x128xf32>, vector<4x128xf32> -> vector<4x128xf32>
    %130 = arith.addf %128, %129 : vector<4x128xf32>
    %131 = vector.extract_strided_slice %130 {offsets = [0, 0], sizes = [4, 32], strides = [1, 1]} : vector<4x128xf32> to vector<4x32xf32>
    %132 = arith.negf %131 : vector<4x32xf32>
    %133 = math.exp %132 : vector<4x32xf32>
    %cst_46 = arith.constant 1.000000e+00 : f32
    %134 = vector.broadcast %cst_46 : f32 to vector<4x32xf32>
    %135 = arith.addf %134, %133 : vector<4x32xf32>
    %136 = arith.divf %134, %135 : vector<4x32xf32>
    %137 = vector.extract_strided_slice %130 {offsets = [0, 32], sizes = [4, 32], strides = [1, 1]} : vector<4x128xf32> to vector<4x32xf32>
    %138 = arith.negf %137 : vector<4x32xf32>
    %139 = math.exp %138 : vector<4x32xf32>
    %cst_47 = arith.constant 1.000000e+00 : f32
    %140 = vector.broadcast %cst_47 : f32 to vector<4x32xf32>
    %141 = arith.addf %140, %139 : vector<4x32xf32>
    %142 = arith.divf %140, %141 : vector<4x32xf32>
    %143 = vector.extract_strided_slice %130 {offsets = [0, 64], sizes = [4, 32], strides = [1, 1]} : vector<4x128xf32> to vector<4x32xf32>
    %144 = math.tanh %143 : vector<4x32xf32>
    %145 = vector.extract_strided_slice %130 {offsets = [0, 96], sizes = [4, 32], strides = [1, 1]} : vector<4x128xf32> to vector<4x32xf32>
    %146 = arith.negf %145 : vector<4x32xf32>
    %147 = math.exp %146 : vector<4x32xf32>
    %cst_48 = arith.constant 1.000000e+00 : f32
    %148 = vector.broadcast %cst_48 : f32 to vector<4x32xf32>
    %149 = arith.addf %148, %147 : vector<4x32xf32>
    %150 = arith.divf %148, %149 : vector<4x32xf32>
    %151 = arith.mulf %142, %124 : vector<4x32xf32>
    %152 = arith.mulf %136, %144 : vector<4x32xf32>
    %153 = arith.addf %151, %152 : vector<4x32xf32>
    %154 = math.tanh %153 : vector<4x32xf32>
    %155 = arith.mulf %150, %154 : vector<4x32xf32>
    %c16_49 = arith.constant 16 : index
    %c0_50 = arith.constant 0 : index
    %156 = vector.load %arg14[%c16_49, %c0_50] : memref<32x32xf32, #tpu.memory_space<vmem>>, vector<4x32xf32>
    tpu.vector_store %arg14[%c16_49, %c0_50], %155 {strides = array<i32>} : memref<32x32xf32, #tpu.memory_space<vmem>>, vector<4x32xf32>,
    %c20 = arith.constant 20 : index
    %c0_51 = arith.constant 0 : index
    %157 = vector.load %arg13[%c20, %c0_51] : memref<32x128xf32, #tpu.memory_space<vmem>>, vector<4x128xf32>
    %cst_52 = arith.constant dense<0.000000e+00> : vector<4x128xf32>
    %158 = tpu.matmul %155, %7, %cst_52 {dimension_numbers = #tpu.dot_dimension_numbers<[1], [0], [0], [1], [0, 0, 1, 1], [], []>} : vector<4x32xf32>, vector<32x128xf32>, vector<4x128xf32> -> vector<4x128xf32>
    %159 = arith.addf %157, %158 : vector<4x128xf32>
    %160 = vector.extract_strided_slice %159 {offsets = [0, 0], sizes = [4, 32], strides = [1, 1]} : vector<4x128xf32> to vector<4x32xf32>
    %161 = arith.negf %160 : vector<4x32xf32>
    %162 = math.exp %161 : vector<4x32xf32>
    %cst_53 = arith.constant 1.000000e+00 : f32
    %163 = vector.broadcast %cst_53 : f32 to vector<4x32xf32>
    %164 = arith.addf %163, %162 : vector<4x32xf32>
    %165 = arith.divf %163, %164 : vector<4x32xf32>
    %166 = vector.extract_strided_slice %159 {offsets = [0, 32], sizes = [4, 32], strides = [1, 1]} : vector<4x128xf32> to vector<4x32xf32>
    %167 = arith.negf %166 : vector<4x32xf32>
    %168 = math.exp %167 : vector<4x32xf32>
    %cst_54 = arith.constant 1.000000e+00 : f32
    %169 = vector.broadcast %cst_54 : f32 to vector<4x32xf32>
    %170 = arith.addf %169, %168 : vector<4x32xf32>
    %171 = arith.divf %169, %170 : vector<4x32xf32>
    %172 = vector.extract_strided_slice %159 {offsets = [0, 64], sizes = [4, 32], strides = [1, 1]} : vector<4x128xf32> to vector<4x32xf32>
    %173 = math.tanh %172 : vector<4x32xf32>
    %174 = vector.extract_strided_slice %159 {offsets = [0, 96], sizes = [4, 32], strides = [1, 1]} : vector<4x128xf32> to vector<4x32xf32>
    %175 = arith.negf %174 : vector<4x32xf32>
    %176 = math.exp %175 : vector<4x32xf32>
    %cst_55 = arith.constant 1.000000e+00 : f32
    %177 = vector.broadcast %cst_55 : f32 to vector<4x32xf32>
    %178 = arith.addf %177, %176 : vector<4x32xf32>
    %179 = arith.divf %177, %178 : vector<4x32xf32>
    %180 = arith.mulf %171, %153 : vector<4x32xf32>
    %181 = arith.mulf %165, %173 : vector<4x32xf32>
    %182 = arith.addf %180, %181 : vector<4x32xf32>
    %183 = math.tanh %182 : vector<4x32xf32>
    %184 = arith.mulf %179, %183 : vector<4x32xf32>
    %c20_56 = arith.constant 20 : index
    %c0_57 = arith.constant 0 : index
    %185 = vector.load %arg14[%c20_56, %c0_57] : memref<32x32xf32, #tpu.memory_space<vmem>>, vector<4x32xf32>
    tpu.vector_store %arg14[%c20_56, %c0_57], %184 {strides = array<i32>} : memref<32x32xf32, #tpu.memory_space<vmem>>, vector<4x32xf32>,
    %c24 = arith.constant 24 : index
    %c0_58 = arith.constant 0 : index
    %186 = vector.load %arg13[%c24, %c0_58] : memref<32x128xf32, #tpu.memory_space<vmem>>, vector<4x128xf32>
    %cst_59 = arith.constant dense<0.000000e+00> : vector<4x128xf32>
    %187 = tpu.matmul %184, %7, %cst_59 {dimension_numbers = #tpu.dot_dimension_numbers<[1], [0], [0], [1], [0, 0, 1, 1], [], []>} : vector<4x32xf32>, vector<32x128xf32>, vector<4x128xf32> -> vector<4x128xf32>
    %188 = arith.addf %186, %187 : vector<4x128xf32>
    %189 = vector.extract_strided_slice %188 {offsets = [0, 0], sizes = [4, 32], strides = [1, 1]} : vector<4x128xf32> to vector<4x32xf32>
    %190 = arith.negf %189 : vector<4x32xf32>
    %191 = math.exp %190 : vector<4x32xf32>
    %cst_60 = arith.constant 1.000000e+00 : f32
    %192 = vector.broadcast %cst_60 : f32 to vector<4x32xf32>
    %193 = arith.addf %192, %191 : vector<4x32xf32>
    %194 = arith.divf %192, %193 : vector<4x32xf32>
    %195 = vector.extract_strided_slice %188 {offsets = [0, 32], sizes = [4, 32], strides = [1, 1]} : vector<4x128xf32> to vector<4x32xf32>
    %196 = arith.negf %195 : vector<4x32xf32>
    %197 = math.exp %196 : vector<4x32xf32>
    %cst_61 = arith.constant 1.000000e+00 : f32
    %198 = vector.broadcast %cst_61 : f32 to vector<4x32xf32>
    %199 = arith.addf %198, %197 : vector<4x32xf32>
    %200 = arith.divf %198, %199 : vector<4x32xf32>
    %201 = vector.extract_strided_slice %188 {offsets = [0, 64], sizes = [4, 32], strides = [1, 1]} : vector<4x128xf32> to vector<4x32xf32>
    %202 = math.tanh %201 : vector<4x32xf32>
    %203 = vector.extract_strided_slice %188 {offsets = [0, 96], sizes = [4, 32], strides = [1, 1]} : vector<4x128xf32> to vector<4x32xf32>
    %204 = arith.negf %203 : vector<4x32xf32>
    %205 = math.exp %204 : vector<4x32xf32>
    %cst_62 = arith.constant 1.000000e+00 : f32
    %206 = vector.broadcast %cst_62 : f32 to vector<4x32xf32>
    %207 = arith.addf %206, %205 : vector<4x32xf32>
    %208 = arith.divf %206, %207 : vector<4x32xf32>
    %209 = arith.mulf %200, %182 : vector<4x32xf32>
    %210 = arith.mulf %194, %202 : vector<4x32xf32>
    %211 = arith.addf %209, %210 : vector<4x32xf32>
    %212 = math.tanh %211 : vector<4x32xf32>
    %213 = arith.mulf %208, %212 : vector<4x32xf32>
    %c24_63 = arith.constant 24 : index
    %c0_64 = arith.constant 0 : index
    %214 = vector.load %arg14[%c24_63, %c0_64] : memref<32x32xf32, #tpu.memory_space<vmem>>, vector<4x32xf32>
    tpu.vector_store %arg14[%c24_63, %c0_64], %213 {strides = array<i32>} : memref<32x32xf32, #tpu.memory_space<vmem>>, vector<4x32xf32>,
    %c28 = arith.constant 28 : index
    %c0_65 = arith.constant 0 : index
    %215 = vector.load %arg13[%c28, %c0_65] : memref<32x128xf32, #tpu.memory_space<vmem>>, vector<4x128xf32>
    %cst_66 = arith.constant dense<0.000000e+00> : vector<4x128xf32>
    %216 = tpu.matmul %213, %7, %cst_66 {dimension_numbers = #tpu.dot_dimension_numbers<[1], [0], [0], [1], [0, 0, 1, 1], [], []>} : vector<4x32xf32>, vector<32x128xf32>, vector<4x128xf32> -> vector<4x128xf32>
    %217 = arith.addf %215, %216 : vector<4x128xf32>
    %218 = vector.extract_strided_slice %217 {offsets = [0, 0], sizes = [4, 32], strides = [1, 1]} : vector<4x128xf32> to vector<4x32xf32>
    %219 = arith.negf %218 : vector<4x32xf32>
    %220 = math.exp %219 : vector<4x32xf32>
    %cst_67 = arith.constant 1.000000e+00 : f32
    %221 = vector.broadcast %cst_67 : f32 to vector<4x32xf32>
    %222 = arith.addf %221, %220 : vector<4x32xf32>
    %223 = arith.divf %221, %222 : vector<4x32xf32>
    %224 = vector.extract_strided_slice %217 {offsets = [0, 32], sizes = [4, 32], strides = [1, 1]} : vector<4x128xf32> to vector<4x32xf32>
    %225 = arith.negf %224 : vector<4x32xf32>
    %226 = math.exp %225 : vector<4x32xf32>
    %cst_68 = arith.constant 1.000000e+00 : f32
    %227 = vector.broadcast %cst_68 : f32 to vector<4x32xf32>
    %228 = arith.addf %227, %226 : vector<4x32xf32>
    %229 = arith.divf %227, %228 : vector<4x32xf32>
    %230 = vector.extract_strided_slice %217 {offsets = [0, 64], sizes = [4, 32], strides = [1, 1]} : vector<4x128xf32> to vector<4x32xf32>
    %231 = math.tanh %230 : vector<4x32xf32>
    %232 = vector.extract_strided_slice %217 {offsets = [0, 96], sizes = [4, 32], strides = [1, 1]} : vector<4x128xf32> to vector<4x32xf32>
    %233 = arith.negf %232 : vector<4x32xf32>
    %234 = math.exp %233 : vector<4x32xf32>
    %cst_69 = arith.constant 1.000000e+00 : f32
    %235 = vector.broadcast %cst_69 : f32 to vector<4x32xf32>
    %236 = arith.addf %235, %234 : vector<4x32xf32>
    %237 = arith.divf %235, %236 : vector<4x32xf32>
    %238 = arith.mulf %229, %211 : vector<4x32xf32>
    %239 = arith.mulf %223, %231 : vector<4x32xf32>
    %240 = arith.addf %238, %239 : vector<4x32xf32>
    %241 = math.tanh %240 : vector<4x32xf32>
    %242 = arith.mulf %237, %241 : vector<4x32xf32>
    %c28_70 = arith.constant 28 : index
    %c0_71 = arith.constant 0 : index
    %243 = vector.load %arg14[%c28_70, %c0_71] : memref<32x32xf32, #tpu.memory_space<vmem>>, vector<4x32xf32>
    tpu.vector_store %arg14[%c28_70, %c0_71], %242 {strides = array<i32>} : memref<32x32xf32, #tpu.memory_space<vmem>>, vector<4x32xf32>,
    %c0_72 = arith.constant 0 : index
    %c0_73 = arith.constant 0 : index
    %244 = vector.load %arg14[%c0_72, %c0_73] : memref<32x32xf32, #tpu.memory_space<vmem>>, vector<32x32xf32>
    %c0_74 = arith.constant 0 : index
    %c0_75 = arith.constant 0 : index
    %245 = vector.load %arg5[%c0_74, %c0_75] : memref<32x128xf32, #tpu.memory_space<vmem>>, vector<32x128xf32>
    %cst_76 = arith.constant dense<0.000000e+00> : vector<32x128xf32>
    %246 = tpu.matmul %244, %245, %cst_76 {dimension_numbers = #tpu.dot_dimension_numbers<[1], [0], [0], [1], [0, 0, 1, 1], [], []>} : vector<32x32xf32>, vector<32x128xf32>, vector<32x128xf32> -> vector<32x128xf32>
    %c0_77 = arith.constant 0 : index
    %c0_78 = arith.constant 0 : index
    %247 = vector.load %arg7[%c0_77, %c0_78] : memref<1x128xf32, #tpu.memory_space<vmem>>, vector<1x128xf32>
    %248 = vector.broadcast %247 : vector<1x128xf32> to vector<32x128xf32>
    %249 = arith.addf %246, %248 : vector<32x128xf32>
    %c0_79 = arith.constant 0 : index
    %c0_80 = arith.constant 0 : index
    %250 = vector.load %arg13[%c0_79, %c0_80] : memref<32x128xf32, #tpu.memory_space<vmem>>, vector<32x128xf32>
    tpu.vector_store %arg13[%c0_79, %c0_80], %249 {strides = array<i32>} : memref<32x128xf32, #tpu.memory_space<vmem>>, vector<32x128xf32>,
    %c0_81 = arith.constant 0 : index
    %c0_82 = arith.constant 0 : index
    %251 = vector.load %arg6[%c0_81, %c0_82] : memref<32x128xf32, #tpu.memory_space<vmem>>, vector<32x128xf32>
    %c1 = arith.constant 1 : index
    %c0_83 = arith.constant 0 : index
    %c0_84 = arith.constant 0 : index
    %252 = vector.load %arg8[%c1, %c0_83, %c0_84] : memref<2x4x32xf32, #tpu.memory_space<vmem>>, vector<1x4x32xf32>
    %253 = vector.shape_cast %252 : vector<1x4x32xf32> to vector<4x32xf32>
    %c1_85 = arith.constant 1 : index
    %c0_86 = arith.constant 0 : index
    %c0_87 = arith.constant 0 : index
    %254 = vector.load %arg9[%c1_85, %c0_86, %c0_87] : memref<2x4x32xf32, #tpu.memory_space<vmem>>, vector<1x4x32xf32>
    %255 = vector.shape_cast %254 : vector<1x4x32xf32> to vector<4x32xf32>
    %c0_88 = arith.constant 0 : index
    %c0_89 = arith.constant 0 : index
    %256 = vector.load %arg13[%c0_88, %c0_89] : memref<32x128xf32, #tpu.memory_space<vmem>>, vector<4x128xf32>
    %cst_90 = arith.constant dense<0.000000e+00> : vector<4x128xf32>
    %257 = tpu.matmul %253, %251, %cst_90 {dimension_numbers = #tpu.dot_dimension_numbers<[1], [0], [0], [1], [0, 0, 1, 1], [], []>} : vector<4x32xf32>, vector<32x128xf32>, vector<4x128xf32> -> vector<4x128xf32>
    %258 = arith.addf %256, %257 : vector<4x128xf32>
    %259 = vector.extract_strided_slice %258 {offsets = [0, 0], sizes = [4, 32], strides = [1, 1]} : vector<4x128xf32> to vector<4x32xf32>
    %260 = arith.negf %259 : vector<4x32xf32>
    %261 = math.exp %260 : vector<4x32xf32>
    %cst_91 = arith.constant 1.000000e+00 : f32
    %262 = vector.broadcast %cst_91 : f32 to vector<4x32xf32>
    %263 = arith.addf %262, %261 : vector<4x32xf32>
    %264 = arith.divf %262, %263 : vector<4x32xf32>
    %265 = vector.extract_strided_slice %258 {offsets = [0, 32], sizes = [4, 32], strides = [1, 1]} : vector<4x128xf32> to vector<4x32xf32>
    %266 = arith.negf %265 : vector<4x32xf32>
    %267 = math.exp %266 : vector<4x32xf32>
    %cst_92 = arith.constant 1.000000e+00 : f32
    %268 = vector.broadcast %cst_92 : f32 to vector<4x32xf32>
    %269 = arith.addf %268, %267 : vector<4x32xf32>
    %270 = arith.divf %268, %269 : vector<4x32xf32>
    %271 = vector.extract_strided_slice %258 {offsets = [0, 64], sizes = [4, 32], strides = [1, 1]} : vector<4x128xf32> to vector<4x32xf32>
    %272 = math.tanh %271 : vector<4x32xf32>
    %273 = vector.extract_strided_slice %258 {offsets = [0, 96], sizes = [4, 32], strides = [1, 1]} : vector<4x128xf32> to vector<4x32xf32>
    %274 = arith.negf %273 : vector<4x32xf32>
    %275 = math.exp %274 : vector<4x32xf32>
    %cst_93 = arith.constant 1.000000e+00 : f32
    %276 = vector.broadcast %cst_93 : f32 to vector<4x32xf32>
    %277 = arith.addf %276, %275 : vector<4x32xf32>
    %278 = arith.divf %276, %277 : vector<4x32xf32>
    %279 = arith.mulf %270, %255 : vector<4x32xf32>
    %280 = arith.mulf %264, %272 : vector<4x32xf32>
    %281 = arith.addf %279, %280 : vector<4x32xf32>
    %282 = math.tanh %281 : vector<4x32xf32>
    %283 = arith.mulf %278, %282 : vector<4x32xf32>
    %c4_94 = arith.constant 4 : index
    %c0_95 = arith.constant 0 : index
    %284 = vector.load %arg13[%c4_94, %c0_95] : memref<32x128xf32, #tpu.memory_space<vmem>>, vector<4x128xf32>
    %cst_96 = arith.constant dense<0.000000e+00> : vector<4x128xf32>
    %285 = tpu.matmul %283, %251, %cst_96 {dimension_numbers = #tpu.dot_dimension_numbers<[1], [0], [0], [1], [0, 0, 1, 1], [], []>} : vector<4x32xf32>, vector<32x128xf32>, vector<4x128xf32> -> vector<4x128xf32>
    %286 = arith.addf %284, %285 : vector<4x128xf32>
    %287 = vector.extract_strided_slice %286 {offsets = [0, 0], sizes = [4, 32], strides = [1, 1]} : vector<4x128xf32> to vector<4x32xf32>
    %288 = arith.negf %287 : vector<4x32xf32>
    %289 = math.exp %288 : vector<4x32xf32>
    %cst_97 = arith.constant 1.000000e+00 : f32
    %290 = vector.broadcast %cst_97 : f32 to vector<4x32xf32>
    %291 = arith.addf %290, %289 : vector<4x32xf32>
    %292 = arith.divf %290, %291 : vector<4x32xf32>
    %293 = vector.extract_strided_slice %286 {offsets = [0, 32], sizes = [4, 32], strides = [1, 1]} : vector<4x128xf32> to vector<4x32xf32>
    %294 = arith.negf %293 : vector<4x32xf32>
    %295 = math.exp %294 : vector<4x32xf32>
    %cst_98 = arith.constant 1.000000e+00 : f32
    %296 = vector.broadcast %cst_98 : f32 to vector<4x32xf32>
    %297 = arith.addf %296, %295 : vector<4x32xf32>
    %298 = arith.divf %296, %297 : vector<4x32xf32>
    %299 = vector.extract_strided_slice %286 {offsets = [0, 64], sizes = [4, 32], strides = [1, 1]} : vector<4x128xf32> to vector<4x32xf32>
    %300 = math.tanh %299 : vector<4x32xf32>
    %301 = vector.extract_strided_slice %286 {offsets = [0, 96], sizes = [4, 32], strides = [1, 1]} : vector<4x128xf32> to vector<4x32xf32>
    %302 = arith.negf %301 : vector<4x32xf32>
    %303 = math.exp %302 : vector<4x32xf32>
    %cst_99 = arith.constant 1.000000e+00 : f32
    %304 = vector.broadcast %cst_99 : f32 to vector<4x32xf32>
    %305 = arith.addf %304, %303 : vector<4x32xf32>
    %306 = arith.divf %304, %305 : vector<4x32xf32>
    %307 = arith.mulf %298, %281 : vector<4x32xf32>
    %308 = arith.mulf %292, %300 : vector<4x32xf32>
    %309 = arith.addf %307, %308 : vector<4x32xf32>
    %310 = math.tanh %309 : vector<4x32xf32>
    %311 = arith.mulf %306, %310 : vector<4x32xf32>
    %c8_100 = arith.constant 8 : index
    %c0_101 = arith.constant 0 : index
    %312 = vector.load %arg13[%c8_100, %c0_101] : memref<32x128xf32, #tpu.memory_space<vmem>>, vector<4x128xf32>
    %cst_102 = arith.constant dense<0.000000e+00> : vector<4x128xf32>
    %313 = tpu.matmul %311, %251, %cst_102 {dimension_numbers = #tpu.dot_dimension_numbers<[1], [0], [0], [1], [0, 0, 1, 1], [], []>} : vector<4x32xf32>, vector<32x128xf32>, vector<4x128xf32> -> vector<4x128xf32>
    %314 = arith.addf %312, %313 : vector<4x128xf32>
    %315 = vector.extract_strided_slice %314 {offsets = [0, 0], sizes = [4, 32], strides = [1, 1]} : vector<4x128xf32> to vector<4x32xf32>
    %316 = arith.negf %315 : vector<4x32xf32>
    %317 = math.exp %316 : vector<4x32xf32>
    %cst_103 = arith.constant 1.000000e+00 : f32
    %318 = vector.broadcast %cst_103 : f32 to vector<4x32xf32>
    %319 = arith.addf %318, %317 : vector<4x32xf32>
    %320 = arith.divf %318, %319 : vector<4x32xf32>
    %321 = vector.extract_strided_slice %314 {offsets = [0, 32], sizes = [4, 32], strides = [1, 1]} : vector<4x128xf32> to vector<4x32xf32>
    %322 = arith.negf %321 : vector<4x32xf32>
    %323 = math.exp %322 : vector<4x32xf32>
    %cst_104 = arith.constant 1.000000e+00 : f32
    %324 = vector.broadcast %cst_104 : f32 to vector<4x32xf32>
    %325 = arith.addf %324, %323 : vector<4x32xf32>
    %326 = arith.divf %324, %325 : vector<4x32xf32>
    %327 = vector.extract_strided_slice %314 {offsets = [0, 64], sizes = [4, 32], strides = [1, 1]} : vector<4x128xf32> to vector<4x32xf32>
    %328 = math.tanh %327 : vector<4x32xf32>
    %329 = vector.extract_strided_slice %314 {offsets = [0, 96], sizes = [4, 32], strides = [1, 1]} : vector<4x128xf32> to vector<4x32xf32>
    %330 = arith.negf %329 : vector<4x32xf32>
    %331 = math.exp %330 : vector<4x32xf32>
    %cst_105 = arith.constant 1.000000e+00 : f32
    %332 = vector.broadcast %cst_105 : f32 to vector<4x32xf32>
    %333 = arith.addf %332, %331 : vector<4x32xf32>
    %334 = arith.divf %332, %333 : vector<4x32xf32>
    %335 = arith.mulf %326, %309 : vector<4x32xf32>
    %336 = arith.mulf %320, %328 : vector<4x32xf32>
    %337 = arith.addf %335, %336 : vector<4x32xf32>
    %338 = math.tanh %337 : vector<4x32xf32>
    %339 = arith.mulf %334, %338 : vector<4x32xf32>
    %c12_106 = arith.constant 12 : index
    %c0_107 = arith.constant 0 : index
    %340 = vector.load %arg13[%c12_106, %c0_107] : memref<32x128xf32, #tpu.memory_space<vmem>>, vector<4x128xf32>
    %cst_108 = arith.constant dense<0.000000e+00> : vector<4x128xf32>
    %341 = tpu.matmul %339, %251, %cst_108 {dimension_numbers = #tpu.dot_dimension_numbers<[1], [0], [0], [1], [0, 0, 1, 1], [], []>} : vector<4x32xf32>, vector<32x128xf32>, vector<4x128xf32> -> vector<4x128xf32>
    %342 = arith.addf %340, %341 : vector<4x128xf32>
    %343 = vector.extract_strided_slice %342 {offsets = [0, 0], sizes = [4, 32], strides = [1, 1]} : vector<4x128xf32> to vector<4x32xf32>
    %344 = arith.negf %343 : vector<4x32xf32>
    %345 = math.exp %344 : vector<4x32xf32>
    %cst_109 = arith.constant 1.000000e+00 : f32
    %346 = vector.broadcast %cst_109 : f32 to vector<4x32xf32>
    %347 = arith.addf %346, %345 : vector<4x32xf32>
    %348 = arith.divf %346, %347 : vector<4x32xf32>
    %349 = vector.extract_strided_slice %342 {offsets = [0, 32], sizes = [4, 32], strides = [1, 1]} : vector<4x128xf32> to vector<4x32xf32>
    %350 = arith.negf %349 : vector<4x32xf32>
    %351 = math.exp %350 : vector<4x32xf32>
    %cst_110 = arith.constant 1.000000e+00 : f32
    %352 = vector.broadcast %cst_110 : f32 to vector<4x32xf32>
    %353 = arith.addf %352, %351 : vector<4x32xf32>
    %354 = arith.divf %352, %353 : vector<4x32xf32>
    %355 = vector.extract_strided_slice %342 {offsets = [0, 64], sizes = [4, 32], strides = [1, 1]} : vector<4x128xf32> to vector<4x32xf32>
    %356 = math.tanh %355 : vector<4x32xf32>
    %357 = vector.extract_strided_slice %342 {offsets = [0, 96], sizes = [4, 32], strides = [1, 1]} : vector<4x128xf32> to vector<4x32xf32>
    %358 = arith.negf %357 : vector<4x32xf32>
    %359 = math.exp %358 : vector<4x32xf32>
    %cst_111 = arith.constant 1.000000e+00 : f32
    %360 = vector.broadcast %cst_111 : f32 to vector<4x32xf32>
    %361 = arith.addf %360, %359 : vector<4x32xf32>
    %362 = arith.divf %360, %361 : vector<4x32xf32>
    %363 = arith.mulf %354, %337 : vector<4x32xf32>
    %364 = arith.mulf %348, %356 : vector<4x32xf32>
    %365 = arith.addf %363, %364 : vector<4x32xf32>
    %366 = math.tanh %365 : vector<4x32xf32>
    %367 = arith.mulf %362, %366 : vector<4x32xf32>
    %c16_112 = arith.constant 16 : index
    %c0_113 = arith.constant 0 : index
    %368 = vector.load %arg13[%c16_112, %c0_113] : memref<32x128xf32, #tpu.memory_space<vmem>>, vector<4x128xf32>
    %cst_114 = arith.constant dense<0.000000e+00> : vector<4x128xf32>
    %369 = tpu.matmul %367, %251, %cst_114 {dimension_numbers = #tpu.dot_dimension_numbers<[1], [0], [0], [1], [0, 0, 1, 1], [], []>} : vector<4x32xf32>, vector<32x128xf32>, vector<4x128xf32> -> vector<4x128xf32>
    %370 = arith.addf %368, %369 : vector<4x128xf32>
    %371 = vector.extract_strided_slice %370 {offsets = [0, 0], sizes = [4, 32], strides = [1, 1]} : vector<4x128xf32> to vector<4x32xf32>
    %372 = arith.negf %371 : vector<4x32xf32>
    %373 = math.exp %372 : vector<4x32xf32>
    %cst_115 = arith.constant 1.000000e+00 : f32
    %374 = vector.broadcast %cst_115 : f32 to vector<4x32xf32>
    %375 = arith.addf %374, %373 : vector<4x32xf32>
    %376 = arith.divf %374, %375 : vector<4x32xf32>
    %377 = vector.extract_strided_slice %370 {offsets = [0, 32], sizes = [4, 32], strides = [1, 1]} : vector<4x128xf32> to vector<4x32xf32>
    %378 = arith.negf %377 : vector<4x32xf32>
    %379 = math.exp %378 : vector<4x32xf32>
    %cst_116 = arith.constant 1.000000e+00 : f32
    %380 = vector.broadcast %cst_116 : f32 to vector<4x32xf32>
    %381 = arith.addf %380, %379 : vector<4x32xf32>
    %382 = arith.divf %380, %381 : vector<4x32xf32>
    %383 = vector.extract_strided_slice %370 {offsets = [0, 64], sizes = [4, 32], strides = [1, 1]} : vector<4x128xf32> to vector<4x32xf32>
    %384 = math.tanh %383 : vector<4x32xf32>
    %385 = vector.extract_strided_slice %370 {offsets = [0, 96], sizes = [4, 32], strides = [1, 1]} : vector<4x128xf32> to vector<4x32xf32>
    %386 = arith.negf %385 : vector<4x32xf32>
    %387 = math.exp %386 : vector<4x32xf32>
    %cst_117 = arith.constant 1.000000e+00 : f32
    %388 = vector.broadcast %cst_117 : f32 to vector<4x32xf32>
    %389 = arith.addf %388, %387 : vector<4x32xf32>
    %390 = arith.divf %388, %389 : vector<4x32xf32>
    %391 = arith.mulf %382, %365 : vector<4x32xf32>
    %392 = arith.mulf %376, %384 : vector<4x32xf32>
    %393 = arith.addf %391, %392 : vector<4x32xf32>
    %394 = math.tanh %393 : vector<4x32xf32>
    %395 = arith.mulf %390, %394 : vector<4x32xf32>
    %c20_118 = arith.constant 20 : index
    %c0_119 = arith.constant 0 : index
    %396 = vector.load %arg13[%c20_118, %c0_119] : memref<32x128xf32, #tpu.memory_space<vmem>>, vector<4x128xf32>
    %cst_120 = arith.constant dense<0.000000e+00> : vector<4x128xf32>
    %397 = tpu.matmul %395, %251, %cst_120 {dimension_numbers = #tpu.dot_dimension_numbers<[1], [0], [0], [1], [0, 0, 1, 1], [], []>} : vector<4x32xf32>, vector<32x128xf32>, vector<4x128xf32> -> vector<4x128xf32>
    %398 = arith.addf %396, %397 : vector<4x128xf32>
    %399 = vector.extract_strided_slice %398 {offsets = [0, 0], sizes = [4, 32], strides = [1, 1]} : vector<4x128xf32> to vector<4x32xf32>
    %400 = arith.negf %399 : vector<4x32xf32>
    %401 = math.exp %400 : vector<4x32xf32>
    %cst_121 = arith.constant 1.000000e+00 : f32
    %402 = vector.broadcast %cst_121 : f32 to vector<4x32xf32>
    %403 = arith.addf %402, %401 : vector<4x32xf32>
    %404 = arith.divf %402, %403 : vector<4x32xf32>
    %405 = vector.extract_strided_slice %398 {offsets = [0, 32], sizes = [4, 32], strides = [1, 1]} : vector<4x128xf32> to vector<4x32xf32>
    %406 = arith.negf %405 : vector<4x32xf32>
    %407 = math.exp %406 : vector<4x32xf32>
    %cst_122 = arith.constant 1.000000e+00 : f32
    %408 = vector.broadcast %cst_122 : f32 to vector<4x32xf32>
    %409 = arith.addf %408, %407 : vector<4x32xf32>
    %410 = arith.divf %408, %409 : vector<4x32xf32>
    %411 = vector.extract_strided_slice %398 {offsets = [0, 64], sizes = [4, 32], strides = [1, 1]} : vector<4x128xf32> to vector<4x32xf32>
    %412 = math.tanh %411 : vector<4x32xf32>
    %413 = vector.extract_strided_slice %398 {offsets = [0, 96], sizes = [4, 32], strides = [1, 1]} : vector<4x128xf32> to vector<4x32xf32>
    %414 = arith.negf %413 : vector<4x32xf32>
    %415 = math.exp %414 : vector<4x32xf32>
    %cst_123 = arith.constant 1.000000e+00 : f32
    %416 = vector.broadcast %cst_123 : f32 to vector<4x32xf32>
    %417 = arith.addf %416, %415 : vector<4x32xf32>
    %418 = arith.divf %416, %417 : vector<4x32xf32>
    %419 = arith.mulf %410, %393 : vector<4x32xf32>
    %420 = arith.mulf %404, %412 : vector<4x32xf32>
    %421 = arith.addf %419, %420 : vector<4x32xf32>
    %422 = math.tanh %421 : vector<4x32xf32>
    %423 = arith.mulf %418, %422 : vector<4x32xf32>
    %c24_124 = arith.constant 24 : index
    %c0_125 = arith.constant 0 : index
    %424 = vector.load %arg13[%c24_124, %c0_125] : memref<32x128xf32, #tpu.memory_space<vmem>>, vector<4x128xf32>
    %cst_126 = arith.constant dense<0.000000e+00> : vector<4x128xf32>
    %425 = tpu.matmul %423, %251, %cst_126 {dimension_numbers = #tpu.dot_dimension_numbers<[1], [0], [0], [1], [0, 0, 1, 1], [], []>} : vector<4x32xf32>, vector<32x128xf32>, vector<4x128xf32> -> vector<4x128xf32>
    %426 = arith.addf %424, %425 : vector<4x128xf32>
    %427 = vector.extract_strided_slice %426 {offsets = [0, 0], sizes = [4, 32], strides = [1, 1]} : vector<4x128xf32> to vector<4x32xf32>
    %428 = arith.negf %427 : vector<4x32xf32>
    %429 = math.exp %428 : vector<4x32xf32>
    %cst_127 = arith.constant 1.000000e+00 : f32
    %430 = vector.broadcast %cst_127 : f32 to vector<4x32xf32>
    %431 = arith.addf %430, %429 : vector<4x32xf32>
    %432 = arith.divf %430, %431 : vector<4x32xf32>
    %433 = vector.extract_strided_slice %426 {offsets = [0, 32], sizes = [4, 32], strides = [1, 1]} : vector<4x128xf32> to vector<4x32xf32>
    %434 = arith.negf %433 : vector<4x32xf32>
    %435 = math.exp %434 : vector<4x32xf32>
    %cst_128 = arith.constant 1.000000e+00 : f32
    %436 = vector.broadcast %cst_128 : f32 to vector<4x32xf32>
    %437 = arith.addf %436, %435 : vector<4x32xf32>
    %438 = arith.divf %436, %437 : vector<4x32xf32>
    %439 = vector.extract_strided_slice %426 {offsets = [0, 64], sizes = [4, 32], strides = [1, 1]} : vector<4x128xf32> to vector<4x32xf32>
    %440 = math.tanh %439 : vector<4x32xf32>
    %441 = vector.extract_strided_slice %426 {offsets = [0, 96], sizes = [4, 32], strides = [1, 1]} : vector<4x128xf32> to vector<4x32xf32>
    %442 = arith.negf %441 : vector<4x32xf32>
    %443 = math.exp %442 : vector<4x32xf32>
    %cst_129 = arith.constant 1.000000e+00 : f32
    %444 = vector.broadcast %cst_129 : f32 to vector<4x32xf32>
    %445 = arith.addf %444, %443 : vector<4x32xf32>
    %446 = arith.divf %444, %445 : vector<4x32xf32>
    %447 = arith.mulf %438, %421 : vector<4x32xf32>
    %448 = arith.mulf %432, %440 : vector<4x32xf32>
    %449 = arith.addf %447, %448 : vector<4x32xf32>
    %450 = math.tanh %449 : vector<4x32xf32>
    %451 = arith.mulf %446, %450 : vector<4x32xf32>
    %c28_130 = arith.constant 28 : index
    %c0_131 = arith.constant 0 : index
    %452 = vector.load %arg13[%c28_130, %c0_131] : memref<32x128xf32, #tpu.memory_space<vmem>>, vector<4x128xf32>
    %cst_132 = arith.constant dense<0.000000e+00> : vector<4x128xf32>
    %453 = tpu.matmul %451, %251, %cst_132 {dimension_numbers = #tpu.dot_dimension_numbers<[1], [0], [0], [1], [0, 0, 1, 1], [], []>} : vector<4x32xf32>, vector<32x128xf32>, vector<4x128xf32> -> vector<4x128xf32>
    %454 = arith.addf %452, %453 : vector<4x128xf32>
    %455 = vector.extract_strided_slice %454 {offsets = [0, 0], sizes = [4, 32], strides = [1, 1]} : vector<4x128xf32> to vector<4x32xf32>
    %456 = arith.negf %455 : vector<4x32xf32>
    %457 = math.exp %456 : vector<4x32xf32>
    %cst_133 = arith.constant 1.000000e+00 : f32
    %458 = vector.broadcast %cst_133 : f32 to vector<4x32xf32>
    %459 = arith.addf %458, %457 : vector<4x32xf32>
    %460 = arith.divf %458, %459 : vector<4x32xf32>
    %461 = vector.extract_strided_slice %454 {offsets = [0, 32], sizes = [4, 32], strides = [1, 1]} : vector<4x128xf32> to vector<4x32xf32>
    %462 = arith.negf %461 : vector<4x32xf32>
    %463 = math.exp %462 : vector<4x32xf32>
    %cst_134 = arith.constant 1.000000e+00 : f32
    %464 = vector.broadcast %cst_134 : f32 to vector<4x32xf32>
    %465 = arith.addf %464, %463 : vector<4x32xf32>
    %466 = arith.divf %464, %465 : vector<4x32xf32>
    %467 = vector.extract_strided_slice %454 {offsets = [0, 64], sizes = [4, 32], strides = [1, 1]} : vector<4x128xf32> to vector<4x32xf32>
    %468 = math.tanh %467 : vector<4x32xf32>
    %469 = vector.extract_strided_slice %454 {offsets = [0, 96], sizes = [4, 32], strides = [1, 1]} : vector<4x128xf32> to vector<4x32xf32>
    %470 = arith.negf %469 : vector<4x32xf32>
    %471 = math.exp %470 : vector<4x32xf32>
    %cst_135 = arith.constant 1.000000e+00 : f32
    %472 = vector.broadcast %cst_135 : f32 to vector<4x32xf32>
    %473 = arith.addf %472, %471 : vector<4x32xf32>
    %474 = arith.divf %472, %473 : vector<4x32xf32>
    %475 = arith.mulf %466, %449 : vector<4x32xf32>
    %476 = arith.mulf %460, %468 : vector<4x32xf32>
    %477 = arith.addf %475, %476 : vector<4x32xf32>
    %478 = math.tanh %477 : vector<4x32xf32>
    %479 = arith.mulf %474, %478 : vector<4x32xf32>
    %c0_136 = arith.constant 0 : index
    %c0_137 = arith.constant 0 : index
    %480 = vector.load %arg10[%c0_136, %c0_137] : memref<32x4xf32, #tpu.memory_space<vmem>>, vector<32x4xf32>
    %cst_138 = arith.constant dense<0.000000e+00> : vector<4x4xf32>
    %481 = tpu.matmul %479, %480, %cst_138 {dimension_numbers = #tpu.dot_dimension_numbers<[1], [0], [0], [1], [0, 0, 1, 1], [], []>} : vector<4x32xf32>, vector<32x4xf32>, vector<4x4xf32> -> vector<4x4xf32>
    %c0_139 = arith.constant 0 : index
    %c0_140 = arith.constant 0 : index
    %482 = vector.load %arg11[%c0_139, %c0_140] : memref<1x4xf32, #tpu.memory_space<vmem>>, vector<1x4xf32>
    %483 = vector.broadcast %482 : vector<1x4xf32> to vector<4x4xf32>
    %484 = arith.addf %481, %483 : vector<4x4xf32>
    %c0_141 = arith.constant 0 : index
    %c0_142 = arith.constant 0 : index
    %485 = vector.load %arg12[%c0_141, %c0_142] : memref<4x4xf32, #tpu.memory_space<vmem>>, vector<4x4xf32>
    tpu.vector_store %arg12[%c0_141, %c0_142], %484 {strides = array<i32>} : memref<4x4xf32, #tpu.memory_space<vmem>>, vector<4x4xf32>,
    return
  }
  func.func @transform_0(%arg0: i32) -> (i32, i32) {
    %c0_i32 = arith.constant 0 : i32
    %c0_i32_0 = arith.constant 0 : i32
    %c0_i32_1 = arith.constant 0 : i32
    return %c0_i32, %c0_i32_0 : i32, i32
  }
  func.func @transform_1(%arg0: i32) -> (i32, i32) {
    %c0_i32 = arith.constant 0 : i32
    %c0_i32_0 = arith.constant 0 : i32
    %c0_i32_1 = arith.constant 0 : i32
    return %c0_i32, %c0_i32_0 : i32, i32
  }
  func.func @transform_2(%arg0: i32) -> (i32, i32) {
    %c0_i32 = arith.constant 0 : i32
    %c0_i32_0 = arith.constant 0 : i32
    %c0_i32_1 = arith.constant 0 : i32
    return %c0_i32, %c0_i32_0 : i32, i32
  }
  func.func @transform_3(%arg0: i32) -> (i32, i32) {
    %c0_i32 = arith.constant 0 : i32
    %c0_i32_0 = arith.constant 0 : i32
    %c0_i32_1 = arith.constant 0 : i32
    return %c0_i32, %c0_i32_0 : i32, i32
  }
  func.func @transform_4(%arg0: i32) -> (i32, i32) {
    %c0_i32 = arith.constant 0 : i32
    %c0_i32_0 = arith.constant 0 : i32
    %c0_i32_1 = arith.constant 0 : i32
    return %c0_i32, %c0_i32_0 : i32, i32
  }
  func.func @transform_5(%arg0: i32) -> (i32, i32) {
    %c0_i32 = arith.constant 0 : i32
    %c0_i32_0 = arith.constant 0 : i32
    %c0_i32_1 = arith.constant 0 : i32
    return %c0_i32, %c0_i32_0 : i32, i32
  }
  func.func @transform_6(%arg0: i32) -> (i32, i32) {
    %c0_i32 = arith.constant 0 : i32
    %c0_i32_0 = arith.constant 0 : i32
    %c0_i32_1 = arith.constant 0 : i32
    return %c0_i32, %c0_i32_0 : i32, i32
  }
  func.func @transform_7(%arg0: i32) -> (i32, i32, i32) {
    %c0_i32 = arith.constant 0 : i32
    %c0_i32_0 = arith.constant 0 : i32
    %c0_i32_1 = arith.constant 0 : i32
    %c0_i32_2 = arith.constant 0 : i32
    return %c0_i32, %c0_i32_0, %c0_i32_1 : i32, i32, i32
  }
  func.func @transform_8(%arg0: i32) -> (i32, i32, i32) {
    %c0_i32 = arith.constant 0 : i32
    %c0_i32_0 = arith.constant 0 : i32
    %c0_i32_1 = arith.constant 0 : i32
    %c0_i32_2 = arith.constant 0 : i32
    return %c0_i32, %c0_i32_0, %c0_i32_1 : i32, i32, i32
  }
  func.func @transform_9(%arg0: i32) -> (i32, i32) {
    %c0_i32 = arith.constant 0 : i32
    %c0_i32_0 = arith.constant 0 : i32
    %c0_i32_1 = arith.constant 0 : i32
    return %c0_i32, %c0_i32_0 : i32, i32
  }
  func.func @transform_10(%arg0: i32) -> (i32, i32) {
    %c0_i32 = arith.constant 0 : i32
    %c0_i32_0 = arith.constant 0 : i32
    %c0_i32_1 = arith.constant 0 : i32
    return %c0_i32, %c0_i32_0 : i32, i32
  }
  func.func @transform_11(%arg0: i32) -> (i32, i32) {
    %c0_i32 = arith.constant 0 : i32
    %c0_i32_0 = arith.constant 0 : i32
    %c0_i32_1 = arith.constant 0 : i32
    return %c0_i32, %c0_i32_0 : i32, i32
  }
}

</mosaic_0001>

<bundles_post_ra>
// kernel: model_forward.1
= control target key start
LH: loop header
LB: loop body
LE: loop exit
PB: predicated region body
PF: predicated region fallthrough
CT: control target
= control target key end

     0   :  { %16 = vsyncpa [#allocation5], 0  ;;  %s3099_s0 = inlined_call_operand.vmem [shape: f32[32,32], index: 0, kind: input, shape index: {}]   ;;  %s3100_s1 = inlined_call_operand.vmem [shape: f32[32,128], index: 1, kind: input, shape index: {}]   ;;  %s3101_s2 = inlined_call_operand.vmem [shape: f32[32,128], index: 2, kind: input, shape index: {}]   ;;  %s3102_s3 = inlined_call_operand.vmem [shape: f32[1,128], index: 3, kind: input, shape index: {}]   ;;  %s3103_s4 = inlined_call_operand.vmem [shape: f32[32,128], index: 4, kind: input, shape index: {}]   ;;  %s3104_s5 = inlined_call_operand.hbm [shape: f32[32,128], index: 5, kind: input, shape index: {}]   ;;  %s3105_s6 = inlined_call_operand.vmem [shape: f32[1,128], index: 6, kind: input, shape index: {}]   ;;  %s3106_s7 = inlined_call_operand.vmem [shape: f32[2,4,32], index: 7, kind: input, shape index: {}]   ;;  %s3107_s8 = inlined_call_operand.vmem [shape: f32[2,4,32], index: 8, kind: input, shape index: {}]   ;;  %s3108_s9 = inlined_call_operand.vmem [shape: f32[32,4], index: 9, kind: input, shape index: {}]   ;;  %s3109_s10 = inlined_call_operand.vmem [shape: f32[1,4], index: 10, kind: input, shape index: {}]   ;;  %s3110_s11 = inlined_call_operand.hbm [shape: f32[4,4], index: 11, kind: output, shape index: {}]  }
   0x1   :  { %17 = vsyncpa [#allocation6], 0  ;;  %s2708_s17 = smov [#allocation4]   ;;  %s2660_s21 = scalar_lea.hbm %s3104_s5, 512 }
   0x2   :  { %s33_s18 = sshll.u32 %s2708_s17, 4  ;;  %p2661_p0 = scmp.ne.s32.totalorder %s3104_s5, %s2660_s21  ;;  %s34_s18 = int_to_ptr.vmem [resolvable:$true] %s33_s18 }
   0x3   :  { %p2664_p1 = scmp.lt.u32.totalorder %s2660_s21, %s3104_s5 }
   0x5   :  { %p2666_p2 = pnand %p2664_p1, %p2661_p0 }
   0x7   :  { %2669 = shalt.err (!%p2666_p2)
}
   0x8   :  { %s2670_s26 = scalar_lea.vmem %s34_s18, 512  ;;  %p2675_p4 = scmp.lt.s32.totalorder %s34_s18, %s34_s18 }
   0x9   :  { %p2671_p3 = scmp.ne.s32.totalorder %s34_s18, %s2670_s26  ;;  %p2676_p5 = scmp.lt.s32.totalorder %s2670_s26, %s2670_s26 }
   0xb   :  { %p2677_p6 = por %p2676_p5, %p2675_p4 }
   0xd   :  { %p2678_p7 = pnand %p2677_p6, %p2671_p3 }
   0xf   :  { %2681 = shalt.err (!%p2678_p7)
}
  0x10   :  { %s2709_s27 = smov 128   ;;  %s2710_s28 = smov 8  }
  0x11   :  { %39 = dma.hbm_to_vmem [thread:$0]  %s3104_s5, 512, %s34_s18, [#allocation5], %s2709_s27, %s2709_s27, %s2710_s28  }
  0x12   :  { %2704 = dma.done.wait [#allocation5], 512  }
  0x13   :  { %2705 = vsyncadd [#allocation5], 4294966784  ;;  %v2711_v0 = vmov 0.0|0.0   ;;  %vm2712_vm0 = vmmov 0   ;;  %v2713_v1 = vmov 0.0   ;;  %vm68_vm1 = vcmask 261120  }
  0x14   :  { %2413 = vmatprep.subr.bf16.mxu1 %v2711_v0  ;;  %2212 = vmatprep.mubr.msk.f32.mxu1 %vm2712_vm0, %v2713_v1  ;;  %v57_v2 = vld [vmem:[%s3100_s1] sm:$0xff]  ;;  %v58_v3 = vld [vmem:[%s3100_s1 + $0x8] sm:$0xff]  ;;  %v59_v4 = vld [vmem:[%s3100_s1 + $0x10] sm:$0xff]  ;;  %s2714_s14 = smov 64   ;;  %vm283_vm2 = vcmask 257024   ;;  %vm2026_vm3 = vcmask 27648  }
  0x15   :  { %v2405_v5 = vpack.c.bf16 %v58_v3, %v57_v2  ;;  %v60_v6 = vld [vmem:[%s3100_s1 + $0x18] sm:$0xff]  ;;  %v53_v7 = vld [vmem:[%s3099_s0] sm:$0xff]  ;;  %v171_v10 = vld [vmem:[%s3101_s2 + $0x8] sm:$0xff] }
  0x16   :  { %v2409_v8 = vpack.c.bf16 %v60_v6, %v59_v4  ;;  %2198 = vmatprep.mubr.msk.f32.mxu0 %vm68_vm1, %v53_v7  ;;  %v170_v9 = vld [vmem:[%s3101_s2] sm:$0xff]  ;;  %v172_v11 = vld [vmem:[%s3101_s2 + $0x10] sm:$0xff]  ;;  %v173_v13 = vld [vmem:[%s3101_s2 + $0x18] sm:$0xff] }
  0x17   :  { %2406 = vmatprep.subr.bf16.mxu0 %v2405_v5  ;;  %v2817_v12 = vpack.c.bf16 %v171_v10, %v170_v9  ;;  %v2823_v14 = vpack.c.bf16 %v173_v13, %v172_v11  ;;  %v54_v15 = vld [vmem:[%s3099_s0 + $0x8] sm:$0xff]  ;;  %v174_v16 = vld [vmem:[%s3106_s7] sm:$0xf]  ;;  %v55_v38 = vld [vmem:[%s3099_s0 + $0x10] sm:$0xff] }
  0x18   :  { %2408 = vmatpush3.bf16.msra.mxu0 %v2405_v5  ;;  %v2043_v17 = vld [vmem:[%s3102_s3] ss:$0 sm:$0xff]  ;;  %s2715_s3 = smov 32   ;;  %v56_v39 = vld [vmem:[%s3099_s0 + $0x18] sm:$0xff] }
  0x19   :  { %2410 = vmatprep.subr.bf16.mxu0 %v2409_v8  ;;  %2415 = vmatpush3.bf16.msra.mxu1 %v2817_v12  ;;  %v175_v27 = vld [vmem:[%s3107_s8] sm:$0xf] }
  0x1a   :  { %2416 = vmatprep.subr.bf16.mxu1 %v2711_v0 }
  0x1c   :  { %2412 = vmatpush3.bf16.msra.mxu0 %v2409_v8 }
  0x1d   :  { %2418 = vmatpush3.bf16.msra.mxu1 %v2823_v14  ;;  %2419 = vmatprep.subr.bf16.mxu0 %v2711_v0 }
  0x1e   :  { %2425 = vmatprep.subr.bf16.mxu1 %v2711_v0 }
  0x1f   :  { %2199 = vmatmul.mubr.msk.f32.vlgmr.msra.gmra.mrb[0].mxu0 %vm68_vm1, %v54_v15 }
  0x20   :  { %2213 = vmatmul.mubr.msk.f32.vlgmr.msra.gmra.mrb[0].mxu1 %vm68_vm1, %v174_v16  ;;  %2421 = vmatpush3.bf16.msra.mxu0 %v2817_v12 }
  0x21   :  { %2422 = vmatprep.subr.bf16.mxu0 %v2711_v0  ;;  %2427 = vmatpush3.bf16.msra.mxu1 %v2817_v12 }
  0x22   :  { %2428 = vmatprep.subr.bf16.mxu1 %v2711_v0  ;;  %2234 = vmatprep.mubr.msk.f32.mxu1 %vm2712_vm0, %v2713_v1 }
  0x23   :  { %2201 = vmatprep.mubr.msk.f32.mxu0 %vm68_vm1, %v55_v38 }
  0x24   :  { %2424 = vmatpush3.bf16.msra.mxu0 %v2823_v14 }
  0x25   :  { %2430 = vmatpush3.bf16.msra.mxu1 %v2823_v14  ;;  %2431 = vmatprep.subr.bf16.mxu0 %v2711_v0 }
  0x26   :  { %2437 = vmatprep.subr.bf16.mxu1 %v2711_v0  ;;  %2202 = vmatmul.mubr.msk.f32.gmra.mrb[2].mxu0 %vm68_vm1, %v56_v39 }
  0x27   :  { %2223 = vmatprep.mubr.msk.f32.mxu0 %vm2712_vm0, %v2713_v1 }
  0xf2   :  { %v2200_v18 = vpop.f32.mrb[0].mxu0 }
  0xf3   :  { %v153_v19 = vadd.f32 %v2200_v18, %v2043_v17  ;;  %v147_v20 = vpop.f32.mrb[1].mxu0  ;;  %v246_v21 = vpop.f32.mrb[0].mxu1 }
  0xf4   :  { %v148_v22 = vadd.f32 %v2043_v17, %v147_v20  ;;  %v2214_v23 = vpop.f32.mrb[1].mxu1 }
  0xf5   :  { %167 = vst [vmem:[#allocation2 + $0x8] sm:$0xff] %v153_v19 }
  0xf6   :  { %166 = vst [vmem:[#allocation2] sm:$0xff] %v148_v22 }
  0xf9   :  { %v2203_v43 = vpop.f32.mrb[2].mxu0 }
  0xfa   :  { %v163_v44 = vadd.f32 %v2203_v43, %v2043_v17  ;;  %v157_v45 = vpop.f32.mrb[3].mxu0 }
  0xfb   :  { %v158_v46 = vadd.f32 %v2043_v17, %v157_v45 }
  0xfc   :  { %169 = vst [vmem:[#allocation2 + $0x18] sm:$0xff] %v163_v44  ;;  %v388_v4 = vld [vmem:[#allocation2 + $0x8] sm:$0xf] }
  0xfd   :  { %v176_v24 = vld [vmem:[#allocation2] sm:$0xf]  ;;  %168 = vst [vmem:[#allocation2 + $0x10] sm:$0xff] %v158_v46  ;;  %v285_v48 = vld [vmem:[#allocation2 + $0x4] sm:$0xf] }
  0xfe   :  { %v250_v25 = vadd.f32 %v246_v21, %v176_v24  ;;  %v491_v24 = vld [vmem:[#allocation2 + $0xc] sm:$0xf] }
 0x100   :  { %2532 = vtanh.f32 %v250_v25  ;;  %v2049_v28 = vmul.f32 -1.442695, %v250_v25 }
 0x102   :  { %2534 = vpow2.f32 %v2049_v28 }
 0x10a   :  { %v2533_v26 = vpop.eup %2532 }
 0x10b   :  { %264 = vrot.lane.b32.xlu0 %v2533_v26, %s2714_s14 }
 0x10c   :  { %v2535_v29 = vpop.eup %2534 }
 0x10d   :  { %v254_v30 = vadd.f32 1.0, %v2535_v29 }
 0x10f   :  { %259 = vrot.lane.b32.xlu0 %v175_v27, %s2715_s3  ;;  %2536 = vrcp.f32 %v254_v30 }
 0x119   :  { %v2537_v31 = vpop.eup %2536 }
 0x17d   :  { %v265_v32 = vpop.permute.xlu0 %264 }
 0x17e   :  { %v267_v33 = vmul.f32 %v2537_v31, %v265_v32 }
 0x180   :  { %269 = vrot.lane.b32.xlu1 %v267_v33, %s2715_s3 }
 0x181   :  { %v260_v34 = vpop.permute.xlu0 %259 }
 0x182   :  { %v262_v35 = vmul.f32 %v2537_v31, %v260_v34 }
 0x1f2   :  { %v270_v36 = vpop.permute.xlu1 %269 }
 0x1f3   :  { %v272_v37 = vadd.f32 %v270_v36, %v262_v35 }
 0x1f5   :  { %2538 = vtanh.f32 %v272_v37 }
 0x1ff   :  { %v2539_v40 = vpop.eup %2538 }
 0x200   :  { %275 = vrot.lane.b32.xlu1 %v2539_v40, %s2714_s14 }
 0x272   :  { %v276_v41 = vpop.permute.xlu1 %275 }
 0x273   :  { %v278_v42 = vmul.f32 %v2537_v31, %v276_v41 }
 0x275   :  { %280 = vrot.lane.b32.xlu0 %v278_v42, %s2715_s3  ;;  %v594_v42 = vld [vmem:[#allocation2 + $0x10] sm:$0xf] }
 0x2e7   :  { %v281_v47 = vpop.permute.xlu0 %280 }
 0x2e8   :  { %284 = vst.msk [vmem:[#allocation3] sm:$0xf] %vm283_vm2, %v281_v47  ;;  %2224 = vmatmul.mubr.msk.f32.vlgmr.msra.gmra.mrb[4].mxu0 %vm68_vm1, %v281_v47 }
 0x2e9   :  { %2433 = vmatpush3.bf16.msra.mxu0 %v2817_v12  ;;  %2245 = vmatprep.mubr.msk.f32.mxu0 %vm2712_vm0, %v2713_v1 }
 0x2ea   :  { %2434 = vmatprep.subr.bf16.mxu0 %v2711_v0 }
 0x2ed   :  { %2436 = vmatpush3.bf16.msra.mxu0 %v2823_v14 }
 0x2ee   :  { %2443 = vmatprep.subr.bf16.mxu0 %v2711_v0 }
 0x3bb   :  { %v354_v49 = vpop.f32.mrb[4].mxu0 }
 0x3bc   :  { %v358_v50 = vadd.f32 %v354_v49, %v285_v48  ;;  %v2225_v51 = vpop.f32.mrb[5].mxu0 }
 0x3be   :  { %2540 = vtanh.f32 %v358_v50  ;;  %v2051_v53 = vmul.f32 -1.442695, %v358_v50 }
 0x3c0   :  { %2542 = vpow2.f32 %v2051_v53 }
 0x3c8   :  { %v2541_v52 = vpop.eup %2540 }
 0x3c9   :  { %368 = vrot.lane.b32.xlu1 %v2541_v52, %s2714_s14 }
 0x3ca   :  { %v2543_v54 = vpop.eup %2542 }
 0x3cb   :  { %v362_v55 = vadd.f32 1.0, %v2543_v54 }
 0x3cd   :  { %2544 = vrcp.f32 %v362_v55 }
 0x3d7   :  { %v2545_v56 = vpop.eup %2544 }
 0x3d8   :  { %v366_v59 = vmul.f32 %v2545_v56, %v272_v37 }
 0x43b   :  { %v369_v57 = vpop.permute.xlu1 %368 }
 0x43c   :  { %v371_v58 = vmul.f32 %v2545_v56, %v369_v57 }
 0x43e   :  { %373 = vrot.lane.b32.xlu0 %v371_v58, %s2715_s3 }
 0x4b0   :  { %v374_v60 = vpop.permute.xlu0 %373 }
 0x4b1   :  { %v376_v61 = vadd.f32 %v374_v60, %v366_v59  ;;  %v697_v60 = vld [vmem:[#allocation2 + $0x14] sm:$0xf] }
 0x4b3   :  { %2546 = vtanh.f32 %v376_v61 }
 0x4bd   :  { %v2547_v62 = vpop.eup %2546 }
 0x4be   :  { %379 = vrot.lane.b32.xlu1 %v2547_v62, %s2714_s14 }
 0x530   :  { %v380_v63 = vpop.permute.xlu1 %379 }
 0x531   :  { %v382_v2 = vmul.f32 %v2545_v56, %v380_v63 }
 0x533   :  { %384 = vrot.lane.b32.xlu0 %v382_v2, %s2715_s3 }
 0x5a5   :  { %v385_v3 = vpop.permute.xlu0 %384 }
 0x5a6   :  { %387 = vst.msk [vmem:[#allocation3 + $0x4] sm:$0xf] %vm283_vm2, %v385_v3  ;;  %2235 = vmatmul.mubr.msk.f32.vlgmr.msra.gmra.mrb[2].mxu1 %vm68_vm1, %v385_v3 }
 0x5a7   :  { %2439 = vmatpush3.bf16.msra.mxu1 %v2817_v12  ;;  %2256 = vmatprep.mubr.msk.f32.mxu1 %vm2712_vm0, %v2713_v1 }
 0x5a8   :  { %2440 = vmatprep.subr.bf16.mxu1 %v2711_v0 }
 0x5ab   :  { %2442 = vmatpush3.bf16.msra.mxu1 %v2823_v14 }
 0x5ac   :  { %2449 = vmatprep.subr.bf16.mxu1 %v2711_v0 }
 0x679   :  { %v457_v5 = vpop.f32.mrb[2].mxu1 }
 0x67a   :  { %v461_v6 = vadd.f32 %v457_v5, %v388_v4  ;;  %v2236_v7 = vpop.f32.mrb[3].mxu1 }
 0x67c   :  { %2548 = vtanh.f32 %v461_v6  ;;  %v2053_v9 = vmul.f32 -1.442695, %v461_v6 }
 0x67e   :  { %2550 = vpow2.f32 %v2053_v9 }
 0x686   :  { %v2549_v8 = vpop.eup %2548 }
 0x687   :  { %471 = vrot.lane.b32.xlu1 %v2549_v8, %s2714_s14 }
 0x688   :  { %v2551_v10 = vpop.eup %2550 }
 0x689   :  { %v465_v11 = vadd.f32 1.0, %v2551_v10  ;;  %v1010_v10 = vld [vmem:[%s3103_s4] sm:$0xff] }
 0x68b   :  { %2552 = vrcp.f32 %v465_v11  ;;  %v1011_v11 = vld [vmem:[%s3103_s4 + $0x8] sm:$0xff] }
 0x695   :  { %v2553_v13 = vpop.eup %2552 }
 0x696   :  { %v469_v17 = vmul.f32 %v2553_v13, %v376_v61 }
 0x6f9   :  { %v472_v15 = vpop.permute.xlu1 %471 }
 0x6fa   :  { %v474_v16 = vmul.f32 %v2553_v13, %v472_v15 }
 0x6fc   :  { %476 = vrot.lane.b32.xlu0 %v474_v16, %s2715_s3 }
 0x76e   :  { %v477_v18 = vpop.permute.xlu0 %476 }
 0x76f   :  { %v479_v19 = vadd.f32 %v477_v18, %v469_v17  ;;  %v1012_v18 = vld [vmem:[%s3103_s4 + $0x10] sm:$0xff] }
 0x771   :  { %2554 = vtanh.f32 %v479_v19 }
 0x77b   :  { %v2555_v20 = vpop.eup %2554 }
 0x77c   :  { %482 = vrot.lane.b32.xlu1 %v2555_v20, %s2714_s14 }
 0x7ee   :  { %v483_v21 = vpop.permute.xlu1 %482 }
 0x7ef   :  { %v485_v22 = vmul.f32 %v2553_v13, %v483_v21  ;;  %v2461_v13 = vpack.c.bf16 %v1011_v11, %v1010_v10 }
 0x7f1   :  { %487 = vrot.lane.b32.xlu0 %v485_v22, %s2715_s3  ;;  %v1006_v22 = vld [vmem:[#allocation3] sm:$0xff] }
 0x863   :  { %v488_v23 = vpop.permute.xlu0 %487 }
 0x864   :  { %490 = vst.msk [vmem:[#allocation3 + $0x8] sm:$0xf] %vm283_vm2, %v488_v23  ;;  %2246 = vmatmul.mubr.msk.f32.vlgmr.msra.gmra.mrb[6].mxu0 %vm68_vm1, %v488_v23 }
 0x865   :  { %2445 = vmatpush3.bf16.msra.mxu0 %v2817_v12  ;;  %2267 = vmatprep.mubr.msk.f32.mxu0 %vm2712_vm0, %v2713_v1 }
 0x866   :  { %2446 = vmatprep.subr.bf16.mxu0 %v2711_v0 }
 0x869   :  { %2448 = vmatpush3.bf16.msra.mxu0 %v2823_v14 }
 0x86a   :  { %2455 = vmatprep.subr.bf16.mxu0 %v2711_v0 }
 0x937   :  { %v560_v25 = vpop.f32.mrb[6].mxu0 }
 0x938   :  { %v564_v26 = vadd.f32 %v560_v25, %v491_v24  ;;  %v2247_v27 = vpop.f32.mrb[7].mxu0  ;;  %v800_v25 = vld [vmem:[#allocation2 + $0x18] sm:$0xf] }
 0x93a   :  { %2556 = vtanh.f32 %v564_v26  ;;  %v2055_v29 = vmul.f32 -1.442695, %v564_v26 }
 0x93c   :  { %2558 = vpow2.f32 %v2055_v29  ;;  %v2948_v29 = vld [vmem:[%s3105_s6] ss:$0 sm:$0xff] }
 0x944   :  { %v2557_v28 = vpop.eup %2556 }
 0x945   :  { %574 = vrot.lane.b32.xlu1 %v2557_v28, %s2714_s14 }
 0x946   :  { %v2559_v30 = vpop.eup %2558 }
 0x947   :  { %v568_v31 = vadd.f32 1.0, %v2559_v30 }
 0x949   :  { %2560 = vrcp.f32 %v568_v31 }
 0x953   :  { %v2561_v32 = vpop.eup %2560 }
 0x954   :  { %v572_v35 = vmul.f32 %v2561_v32, %v479_v19  ;;  %v1013_v19 = vld [vmem:[%s3103_s4 + $0x18] sm:$0xff] }
 0x955   :  { %v2465_v20 = vpack.c.bf16 %v1013_v19, %v1012_v18 }
 0x9b7   :  { %v575_v33 = vpop.permute.xlu1 %574 }
 0x9b8   :  { %v577_v34 = vmul.f32 %v2561_v32, %v575_v33 }
 0x9ba   :  { %579 = vrot.lane.b32.xlu0 %v577_v34, %s2715_s3 }
 0xa2c   :  { %v580_v36 = vpop.permute.xlu0 %579 }
 0xa2d   :  { %v582_v37 = vadd.f32 %v580_v36, %v572_v35 }
 0xa2f   :  { %2562 = vtanh.f32 %v582_v37 }
 0xa39   :  { %v2563_v38 = vpop.eup %2562 }
 0xa3a   :  { %585 = vrot.lane.b32.xlu1 %v2563_v38, %s2714_s14 }
 0xaac   :  { %v586_v39 = vpop.permute.xlu1 %585 }
 0xaad   :  { %v588_v40 = vmul.f32 %v2561_v32, %v586_v39 }
 0xaaf   :  { %590 = vrot.lane.b32.xlu0 %v588_v40, %s2715_s3 }
 0xb21   :  { %v591_v41 = vpop.permute.xlu0 %590 }
 0xb22   :  { %593 = vst.msk [vmem:[#allocation3 + $0xc] sm:$0xf] %vm283_vm2, %v591_v41  ;;  %2257 = vmatmul.mubr.msk.f32.vlgmr.msra.gmra.mrb[4].mxu1 %vm68_vm1, %v591_v41 }
 0xb23   :  { %2451 = vmatpush3.bf16.msra.mxu1 %v2817_v12  ;;  %2278 = vmatprep.mubr.msk.f32.mxu1 %vm2712_vm0, %v2713_v1 }
 0xb24   :  { %2452 = vmatprep.subr.bf16.mxu1 %v2711_v0 }
 0xb27   :  { %2454 = vmatpush3.bf16.msra.mxu1 %v2823_v14 }
 0xb28   :  { %2462 = vmatprep.subr.bf16.mxu1 %v2461_v13 }
 0xb29   :  { %v1007_v23 = vld [vmem:[#allocation3 + $0x8] sm:$0xff] }
 0xbf5   :  { %v663_v43 = vpop.f32.mrb[4].mxu1 }
 0xbf6   :  { %v667_v44 = vadd.f32 %v663_v43, %v594_v42  ;;  %v2258_v45 = vpop.f32.mrb[5].mxu1 }
 0xbf7   :  { %v1122_v45 = vld [vmem:[#allocation4] sm:$0xff] }
 0xbf8   :  { %2564 = vtanh.f32 %v667_v44  ;;  %v2057_v47 = vmul.f32 -1.442695, %v667_v44 }
 0xbfa   :  { %2566 = vpow2.f32 %v2057_v47 }
 0xc02   :  { %v2565_v46 = vpop.eup %2564 }
 0xc03   :  { %677 = vrot.lane.b32.xlu1 %v2565_v46, %s2714_s14  ;;  %v1123_v46 = vld [vmem:[#allocation4 + $0x8] sm:$0xff] }
 0xc04   :  { %v2567_v48 = vpop.eup %2566  ;;  %v2958_v47 = vpack.c.bf16 %v1123_v46, %v1122_v45 }
 0xc05   :  { %v671_v49 = vadd.f32 1.0, %v2567_v48  ;;  %v1124_v48 = vld [vmem:[#allocation4 + $0x10] sm:$0xff] }
 0xc07   :  { %2568 = vrcp.f32 %v671_v49  ;;  %v1125_v49 = vld [vmem:[#allocation4 + $0x18] sm:$0xff] }
 0xc11   :  { %v2569_v50 = vpop.eup %2568 }
 0xc12   :  { %v675_v53 = vmul.f32 %v2569_v50, %v582_v37 }
 0xc75   :  { %v678_v51 = vpop.permute.xlu1 %677 }
 0xc76   :  { %v680_v52 = vmul.f32 %v2569_v50, %v678_v51 }
 0xc78   :  { %682 = vrot.lane.b32.xlu0 %v680_v52, %s2715_s3 }
 0xcea   :  { %v683_v54 = vpop.permute.xlu0 %682 }
 0xceb   :  { %v685_v55 = vadd.f32 %v683_v54, %v675_v53  ;;  %v2069_v54 = vld [vmem:[%s3106_s7 + $0x4] sm:$0xf] }
 0xced   :  { %2570 = vtanh.f32 %v685_v55 }
 0xcf7   :  { %v2571_v56 = vpop.eup %2570 }
 0xcf8   :  { %688 = vrot.lane.b32.xlu1 %v2571_v56, %s2714_s14 }
 0xd6a   :  { %v689_v57 = vpop.permute.xlu1 %688 }
 0xd6b   :  { %v691_v58 = vmul.f32 %v2569_v50, %v689_v57  ;;  %v2962_v50 = vpack.c.bf16 %v1125_v49, %v1124_v48 }
 0xd6d   :  { %693 = vrot.lane.b32.xlu0 %v691_v58, %s2715_s3 }
 0xddf   :  { %v694_v59 = vpop.permute.xlu0 %693 }
 0xde0   :  { %696 = vst.msk [vmem:[#allocation3 + $0x10] sm:$0xf] %vm283_vm2, %v694_v59  ;;  %2268 = vmatmul.mubr.msk.f32.vlgmr.msra.gmra.mrb[8].mxu0 %vm68_vm1, %v694_v59 }
 0xde1   :  { %2457 = vmatpush3.bf16.msra.mxu0 %v2817_v12  ;;  %2289 = vmatprep.mubr.msk.f32.mxu0 %vm2712_vm0, %v2713_v1 }
 0xde2   :  { %2458 = vmatprep.subr.bf16.mxu0 %v2711_v0 }
 0xde5   :  { %2460 = vmatpush3.bf16.msra.mxu0 %v2823_v14 }
 0xde6   :  { %2469 = vmatprep.subr.bf16.mxu0 %v2711_v0 }
 0xeb3   :  { %v766_v61 = vpop.f32.mrb[8].mxu0 }
 0xeb4   :  { %v770_v62 = vadd.f32 %v766_v61, %v697_v60  ;;  %v2269_v63 = vpop.f32.mrb[9].mxu0 }
 0xeb6   :  { %2572 = vtanh.f32 %v770_v62  ;;  %v2059_v3 = vmul.f32 -1.442695, %v770_v62 }
 0xeb8   :  { %2574 = vpow2.f32 %v2059_v3  ;;  %v2070_v3 = vld [vmem:[%s3107_s8 + $0x4] sm:$0xf] }
 0xec0   :  { %v2573_v2 = vpop.eup %2572 }
 0xec1   :  { %780 = vrot.lane.b32.xlu1 %v2573_v2, %s2714_s14 }
 0xec2   :  { %v2575_v12 = vpop.eup %2574 }
 0xec3   :  { %v774_v4 = vadd.f32 1.0, %v2575_v12 }
 0xec5   :  { %2576 = vrcp.f32 %v774_v4 }
 0xecf   :  { %v2577_v5 = vpop.eup %2576 }
 0xed0   :  { %v778_v14 = vmul.f32 %v2577_v5, %v685_v55  ;;  %v903_v55 = vld [vmem:[#allocation2 + $0x1c] sm:$0xf] }
 0xf33   :  { %v781_v6 = vpop.permute.xlu1 %780 }
 0xf34   :  { %v783_v7 = vmul.f32 %v2577_v5, %v781_v6 }
 0xf36   :  { %785 = vrot.lane.b32.xlu0 %v783_v7, %s2715_s3 }
 0xfa8   :  { %v786_v8 = vpop.permute.xlu0 %785 }
 0xfa9   :  { %v788_v9 = vadd.f32 %v786_v8, %v778_v14 }
 0xfab   :  { %2578 = vtanh.f32 %v788_v9 }
 0xfb5   :  { %v2579_v15 = vpop.eup %2578 }
 0xfb6   :  { %791 = vrot.lane.b32.xlu1 %v2579_v15, %s2714_s14 }
0x1028   :  { %v792_v16 = vpop.permute.xlu1 %791 }
0x1029   :  { %v794_v17 = vmul.f32 %v2577_v5, %v792_v16 }
0x102b   :  { %796 = vrot.lane.b32.xlu0 %v794_v17, %s2715_s3 }
0x109d   :  { %v797_v21 = vpop.permute.xlu0 %796 }
0x109e   :  { %799 = vst.msk [vmem:[#allocation3 + $0x14] sm:$0xf] %vm283_vm2, %v797_v21  ;;  %2279 = vmatmul.mubr.msk.f32.vlgmr.msra.gmra.mrb[6].mxu1 %vm68_vm1, %v797_v21 }
0x109f   :  { %2464 = vmatpush3.bf16.msra.mxu1 %v2461_v13  ;;  %2300 = vmatprep.mubr.msk.f32.mxu1 %vm68_vm1, %v1006_v22 }
0x10a0   :  { %2466 = vmatprep.subr.bf16.mxu1 %v2465_v20 }
0x10a3   :  { %2468 = vmatpush3.bf16.msra.mxu1 %v2465_v20 }
0x10a4   :  { %2475 = vmatprep.subr.bf16.mxu1 %v2711_v0 }
0x10a5   :  { %v1008_v24 = vld [vmem:[#allocation3 + $0x10] sm:$0xff] }
0x10a6   :  { %2301 = vmatmul.mubr.msk.f32.vlgmr.msra.gmra.mrb[8].mxu1 %vm68_vm1, %v1007_v23 }
0x10a7   :  { %2303 = vmatprep.mubr.msk.f32.mxu1 %vm68_vm1, %v1008_v24  ;;  %2477 = vmatpush3.bf16.msra.mxu1 %v2958_v47 }
0x10a8   :  { %2478 = vmatprep.subr.bf16.mxu1 %v2711_v0 }
0x10ab   :  { %2480 = vmatpush3.bf16.msra.mxu1 %v2962_v50 }
0x10ac   :  { %2487 = vmatprep.subr.bf16.mxu1 %v2711_v0 }
0x1171   :  { %v869_v26 = vpop.f32.mrb[6].mxu1 }
0x1172   :  { %v873_v27 = vadd.f32 %v869_v26, %v800_v25  ;;  %v2280_v28 = vpop.f32.mrb[7].mxu1 }
0x1174   :  { %2580 = vtanh.f32 %v873_v27  ;;  %v2061_v35 = vmul.f32 -1.442695, %v873_v27 }
0x1176   :  { %2582 = vpow2.f32 %v2061_v35 }
0x1179   :  { %v2302_v30 = vpop.f32.mrb[8].mxu1 }
0x117a   :  { %v1105_v31 = vadd.f32 %v2302_v30, %v2948_v29  ;;  %v1099_v32 = vpop.f32.mrb[9].mxu1 }
0x117b   :  { %v1100_v33 = vadd.f32 %v2948_v29, %v1099_v32 }
0x117c   :  { %1119 = vst [vmem:[#allocation2 + $0x8] sm:$0xff] %v1105_v31 }
0x117d   :  { %1118 = vst [vmem:[#allocation2] sm:$0xff] %v1100_v33 }
0x117e   :  { %v2581_v34 = vpop.eup %2580 }
0x117f   :  { %883 = vrot.lane.b32.xlu1 %v2581_v34, %s2714_s14 }
0x1180   :  { %v2583_v36 = vpop.eup %2582 }
0x1181   :  { %v877_v37 = vadd.f32 1.0, %v2583_v36 }
0x1183   :  { %2584 = vrcp.f32 %v877_v37 }
0x1184   :  { %v1130_v59 = vld [vmem:[#allocation2] sm:$0xf]  ;;  %v1233_v37 = vld [vmem:[#allocation2 + $0x4] sm:$0xf] }
0x118d   :  { %v2585_v38 = vpop.eup %2584 }
0x118e   :  { %v881_v41 = vmul.f32 %v2585_v38, %v788_v9 }
0x11f1   :  { %v884_v39 = vpop.permute.xlu1 %883 }
0x11f2   :  { %v886_v40 = vmul.f32 %v2585_v38, %v884_v39 }
0x11f4   :  { %888 = vrot.lane.b32.xlu0 %v886_v40, %s2715_s3 }
0x1266   :  { %v889_v42 = vpop.permute.xlu0 %888 }
0x1267   :  { %v2954_v43 = vadd.f32 %v889_v42, %v881_v41 }
0x1269   :  { %2586 = vtanh.f32 %v2954_v43 }
0x1273   :  { %v2587_v44 = vpop.eup %2586 }
0x1274   :  { %894 = vrot.lane.b32.xlu1 %v2587_v44, %s2714_s14 }
0x12e6   :  { %v895_v51 = vpop.permute.xlu1 %894 }
0x12e7   :  { %v897_v52 = vmul.f32 %v2585_v38, %v895_v51 }
0x12e9   :  { %899 = vrot.lane.b32.xlu0 %v897_v52, %s2715_s3 }
0x135b   :  { %v900_v53 = vpop.permute.xlu0 %899 }
0x135c   :  { %902 = vst.msk [vmem:[#allocation3 + $0x18] sm:$0xf] %vm283_vm2, %v900_v53  ;;  %2290 = vmatmul.mubr.msk.f32.vlgmr.msra.gmra.mrb[10].mxu0 %vm68_vm1, %v900_v53 }
0x135d   :  { %2471 = vmatpush3.bf16.msra.mxu0 %v2958_v47  ;;  %2314 = vmatprep.mubr.msk.f32.mxu0 %vm2712_vm0, %v2713_v1 }
0x135e   :  { %2472 = vmatprep.subr.bf16.mxu0 %v2711_v0 }
0x1361   :  { %2474 = vmatpush3.bf16.msra.mxu0 %v2962_v50 }
0x1362   :  { %2481 = vmatprep.subr.bf16.mxu0 %v2711_v0 }
0x1364   :  { %2315 = vmatmul.mubr.msk.f32.vlgmr.msra.gmra.mrb[12].mxu0 %vm68_vm1, %v2069_v54 }
0x1365   :  { %2483 = vmatpush3.bf16.msra.mxu0 %v2958_v47  ;;  %2336 = vmatprep.mubr.msk.f32.mxu0 %vm2712_vm0, %v2713_v1 }
0x1366   :  { %2484 = vmatprep.subr.bf16.mxu0 %v2711_v0 }
0x1369   :  { %2486 = vmatpush3.bf16.msra.mxu0 %v2962_v50 }
0x136a   :  { %2493 = vmatprep.subr.bf16.mxu0 %v2711_v0 }
0x142f   :  { %v972_v56 = vpop.f32.mrb[10].mxu0 }
0x1430   :  { %v976_v57 = vadd.f32 %v972_v56, %v903_v55  ;;  %v2291_v58 = vpop.f32.mrb[11].mxu0  ;;  %v1334_v56 = vld [vmem:[#allocation2 + $0x8] sm:$0xf] }
0x1432   :  { %2588 = vtanh.f32 %v976_v57  ;;  %v2063_v12 = vmul.f32 -1.442695, %v976_v57 }
0x1437   :  { %v1200_v60 = vpop.f32.mrb[12].mxu0 }
0x1438   :  { %v1204_v61 = vadd.f32 %v1200_v60, %v1130_v59  ;;  %v2316_v62 = vpop.f32.mrb[13].mxu0 }
0x143a   :  { %2590 = vtanh.f32 %v1204_v61  ;;  %v2072_v4 = vmul.f32 -1.442695, %v1204_v61 }
0x143b   :  { %2592 = vpow2.f32 %v2063_v12 }
0x143c   :  { %v2589_v63 = vpop.eup %2588  ;;  %2594 = vpow2.f32 %v2072_v4 }
0x143d   :  { %986 = vrot.lane.b32.xlu1 %v2589_v63, %s2714_s14 }
0x1444   :  { %v2591_v2 = vpop.eup %2590 }
0x1445   :  { %1218 = vrot.lane.b32.xlu0 %v2591_v2, %s2714_s14  ;;  %v2593_v5 = vpop.eup %2592 }
0x1446   :  { %v980_v6 = vadd.f32 1.0, %v2593_v5  ;;  %v2595_v7 = vpop.eup %2594 }
0x1447   :  { %v1208_v14 = vadd.f32 1.0, %v2595_v7 }
0x1448   :  { %2596 = vrcp.f32 %v980_v6 }
0x1449   :  { %1213 = vrot.lane.b32.xlu0 %v2070_v3, %s2715_s3  ;;  %2598 = vrcp.f32 %v1208_v14 }
0x1452   :  { %v2597_v8 = vpop.eup %2596 }
0x1453   :  { %v2599_v11 = vpop.eup %2598  ;;  %v984_v16 = vmul.f32 %v2597_v8, %v2954_v43 }
0x14af   :  { %v987_v9 = vpop.permute.xlu1 %986 }
0x14b0   :  { %v989_v10 = vmul.f32 %v2597_v8, %v987_v9 }
0x14b2   :  { %991 = vrot.lane.b32.xlu1 %v989_v10, %s2715_s3  ;;  %v1435_v10 = vld [vmem:[#allocation2 + $0xc] sm:$0xf] }
0x14b7   :  { %v1219_v13 = vpop.permute.xlu0 %1218 }
0x14b8   :  { %v1221_v15 = vmul.f32 %v2599_v11, %v1219_v13 }
0x14ba   :  { %1223 = vrot.lane.b32.xlu1 %v1221_v15, %s2715_s3 }
0x14bb   :  { %v1214_v19 = vpop.permute.xlu0 %1213 }
0x14bc   :  { %v1216_v20 = vmul.f32 %v2599_v11, %v1214_v19 }
0x1524   :  { %v992_v17 = vpop.permute.xlu1 %991 }
0x1525   :  { %v994_v18 = vadd.f32 %v992_v17, %v984_v16 }
0x1527   :  { %2600 = vtanh.f32 %v994_v18 }
0x152c   :  { %v1224_v21 = vpop.permute.xlu1 %1223 }
0x152d   :  { %v1226_v22 = vadd.f32 %v1224_v21, %v1216_v20 }
0x152f   :  { %2602 = vtanh.f32 %v1226_v22 }
0x1531   :  { %v2601_v23 = vpop.eup %2600 }
0x1532   :  { %997 = vrot.lane.b32.xlu0 %v2601_v23, %s2714_s14 }
0x1539   :  { %v2603_v24 = vpop.eup %2602 }
0x153a   :  { %1229 = vrot.lane.b32.xlu1 %v2603_v24, %s2714_s14 }
0x15a4   :  { %v998_v25 = vpop.permute.xlu0 %997 }
0x15a5   :  { %v1000_v26 = vmul.f32 %v2597_v8, %v998_v25 }
0x15a7   :  { %1002 = vrot.lane.b32.xlu0 %v1000_v26, %s2715_s3 }
0x15ac   :  { %v1230_v27 = vpop.permute.xlu1 %1229 }
0x15ad   :  { %v1232_v28 = vmul.f32 %v2599_v11, %v1230_v27 }
0x15af   :  { %1235 = vrot.lane.b32.xlu1 %v1232_v28, %s2715_s3 }
0x1619   :  { %v1003_v30 = vpop.permute.xlu0 %1002 }
0x161a   :  { %1005 = vst.msk [vmem:[#allocation3 + $0x1c] sm:$0xf] %vm283_vm2, %v1003_v30 }
0x1621   :  { %v1009_v31 = vld [vmem:[#allocation3 + $0x18] sm:$0xff]  ;;  %v1236_v32 = vpop.permute.xlu1 %1235 }
0x1622   :  { %2304 = vmatmul.mubr.msk.f32.gmra.mrb[10].mxu1 %vm68_vm1, %v1009_v31 }
0x1623   :  { %2325 = vmatprep.mubr.msk.f32.mxu1 %vm2712_vm0, %v2713_v1 }
0x1626   :  { %2326 = vmatmul.mubr.msk.f32.vlgmr.msra.gmra.mrb[12].mxu1 %vm68_vm1, %v1236_v32 }
0x1627   :  { %2489 = vmatpush3.bf16.msra.mxu1 %v2958_v47  ;;  %2347 = vmatprep.mubr.msk.f32.mxu1 %vm2712_vm0, %v2713_v1 }
0x1628   :  { %2490 = vmatprep.subr.bf16.mxu1 %v2711_v0 }
0x162b   :  { %2492 = vmatpush3.bf16.msra.mxu1 %v2962_v50 }
0x162c   :  { %2499 = vmatprep.subr.bf16.mxu1 %v2711_v0 }
0x16f5   :  { %v2305_v33 = vpop.f32.mrb[10].mxu1 }
0x16f6   :  { %v1115_v34 = vadd.f32 %v2305_v33, %v2948_v29  ;;  %v1109_v35 = vpop.f32.mrb[11].mxu1 }
0x16f7   :  { %v1110_v36 = vadd.f32 %v2948_v29, %v1109_v35 }
0x16f8   :  { %1121 = vst [vmem:[#allocation2 + $0x18] sm:$0xff] %v1115_v34 }
0x16f9   :  { %1120 = vst [vmem:[#allocation2 + $0x10] sm:$0xff] %v1110_v36  ;;  %v1305_v38 = vpop.f32.mrb[12].mxu1 }
0x16fa   :  { %v1309_v39 = vadd.f32 %v1305_v38, %v1233_v37  ;;  %v2327_v40 = vpop.f32.mrb[13].mxu1 }
0x16fc   :  { %2604 = vtanh.f32 %v1309_v39  ;;  %v2074_v42 = vmul.f32 -1.442695, %v1309_v39 }
0x16fe   :  { %2606 = vpow2.f32 %v2074_v42 }
0x1700   :  { %v1536_v31 = vld [vmem:[#allocation2 + $0x10] sm:$0xf] }
0x1706   :  { %v2605_v41 = vpop.eup %2604 }
0x1707   :  { %1319 = vrot.lane.b32.xlu0 %v2605_v41, %s2714_s14 }
0x1708   :  { %v2607_v43 = vpop.eup %2606 }
0x1709   :  { %v1313_v44 = vadd.f32 1.0, %v2607_v43 }
0x170b   :  { %2608 = vrcp.f32 %v1313_v44 }
0x1715   :  { %v2609_v45 = vpop.eup %2608 }
0x1716   :  { %v1317_v29 = vmul.f32 %v2609_v45, %v1226_v22 }
0x1779   :  { %v1320_v46 = vpop.permute.xlu0 %1319 }
0x177a   :  { %v1322_v48 = vmul.f32 %v2609_v45, %v1320_v46 }
0x177c   :  { %1324 = vrot.lane.b32.xlu1 %v1322_v48, %s2715_s3 }
0x17ee   :  { %v1325_v49 = vpop.permute.xlu1 %1324 }
0x17ef   :  { %v1327_v51 = vadd.f32 %v1325_v49, %v1317_v29  ;;  %v1637_v49 = vld [vmem:[#allocation2 + $0x14] sm:$0xf] }
0x17f1   :  { %2610 = vtanh.f32 %v1327_v51 }
0x17fb   :  { %v2611_v52 = vpop.eup %2610 }
0x17fc   :  { %1330 = vrot.lane.b32.xlu0 %v2611_v52, %s2714_s14 }
0x186e   :  { %v1331_v53 = vpop.permute.xlu0 %1330 }
0x186f   :  { %v1333_v54 = vmul.f32 %v2609_v45, %v1331_v53 }
0x1871   :  { %1336 = vrot.lane.b32.xlu1 %v1333_v54, %s2715_s3 }
0x18e3   :  { %v1337_v55 = vpop.permute.xlu1 %1336 }
0x18e4   :  { %2337 = vmatmul.mubr.msk.f32.vlgmr.msra.gmra.mrb[14].mxu0 %vm68_vm1, %v1337_v55 }
0x18e5   :  { %2495 = vmatpush3.bf16.msra.mxu0 %v2958_v47  ;;  %2358 = vmatprep.mubr.msk.f32.mxu0 %vm2712_vm0, %v2713_v1 }
0x18e6   :  { %2496 = vmatprep.subr.bf16.mxu0 %v2711_v0 }
0x18e9   :  { %2498 = vmatpush3.bf16.msra.mxu0 %v2962_v50 }
0x18ea   :  { %2505 = vmatprep.subr.bf16.mxu0 %v2711_v0 }
0x19b7   :  { %v1406_v57 = vpop.f32.mrb[14].mxu0 }
0x19b8   :  { %v1410_v58 = vadd.f32 %v1406_v57, %v1334_v56  ;;  %v2338_v59 = vpop.f32.mrb[15].mxu0 }
0x19ba   :  { %2612 = vtanh.f32 %v1410_v58  ;;  %v2076_v61 = vmul.f32 -1.442695, %v1410_v58 }
0x19bc   :  { %2614 = vpow2.f32 %v2076_v61 }
0x19c4   :  { %v2613_v60 = vpop.eup %2612 }
0x19c5   :  { %1420 = vrot.lane.b32.xlu0 %v2613_v60, %s2714_s14 }
0x19c6   :  { %v2615_v62 = vpop.eup %2614 }
0x19c7   :  { %v1414_v63 = vadd.f32 1.0, %v2615_v62 }
0x19c9   :  { %2616 = vrcp.f32 %v1414_v63 }
0x19d3   :  { %v2617_v2 = vpop.eup %2616 }
0x19d4   :  { %v1418_v4 = vmul.f32 %v2617_v2, %v1327_v51 }
0x1a37   :  { %v1421_v3 = vpop.permute.xlu0 %1420 }
0x1a38   :  { %v1423_v12 = vmul.f32 %v2617_v2, %v1421_v3 }
0x1a3a   :  { %1425 = vrot.lane.b32.xlu1 %v1423_v12, %s2715_s3  ;;  %v1738_v12 = vld [vmem:[#allocation2 + $0x18] sm:$0xf] }
0x1aac   :  { %v1426_v5 = vpop.permute.xlu1 %1425 }
0x1aad   :  { %v1428_v6 = vadd.f32 %v1426_v5, %v1418_v4 }
0x1aaf   :  { %2618 = vtanh.f32 %v1428_v6 }
0x1ab9   :  { %v2619_v7 = vpop.eup %2618 }
0x1aba   :  { %1431 = vrot.lane.b32.xlu0 %v2619_v7, %s2714_s14 }
0x1b2c   :  { %v1432_v14 = vpop.permute.xlu0 %1431 }
0x1b2d   :  { %v1434_v8 = vmul.f32 %v2617_v2, %v1432_v14 }
0x1b2f   :  { %1437 = vrot.lane.b32.xlu1 %v1434_v8, %s2715_s3 }
0x1ba1   :  { %v1438_v9 = vpop.permute.xlu1 %1437 }
0x1ba2   :  { %2348 = vmatmul.mubr.msk.f32.vlgmr.msra.gmra.mrb[14].mxu1 %vm68_vm1, %v1438_v9 }
0x1ba3   :  { %2501 = vmatpush3.bf16.msra.mxu1 %v2958_v47  ;;  %2369 = vmatprep.mubr.msk.f32.mxu1 %vm2712_vm0, %v2713_v1 }
0x1ba4   :  { %2502 = vmatprep.subr.bf16.mxu1 %v2711_v0 }
0x1ba7   :  { %2504 = vmatpush3.bf16.msra.mxu1 %v2962_v50 }
0x1ba8   :  { %2511 = vmatprep.subr.bf16.mxu1 %v2711_v0 }
0x1c75   :  { %v1507_v11 = vpop.f32.mrb[14].mxu1 }
0x1c76   :  { %v1511_v13 = vadd.f32 %v1507_v11, %v1435_v10  ;;  %v2349_v15 = vpop.f32.mrb[15].mxu1 }
0x1c78   :  { %2620 = vtanh.f32 %v1511_v13  ;;  %v2078_v17 = vmul.f32 -1.442695, %v1511_v13 }
0x1c7a   :  { %2622 = vpow2.f32 %v2078_v17 }
0x1c82   :  { %v2621_v16 = vpop.eup %2620 }
0x1c83   :  { %1521 = vrot.lane.b32.xlu0 %v2621_v16, %s2714_s14 }
0x1c84   :  { %v2623_v18 = vpop.eup %2622 }
0x1c85   :  { %v1515_v19 = vadd.f32 1.0, %v2623_v18 }
0x1c87   :  { %2624 = vrcp.f32 %v1515_v19 }
0x1c91   :  { %v2625_v20 = vpop.eup %2624 }
0x1c92   :  { %v1519_v23 = vmul.f32 %v2625_v20, %v1428_v6 }
0x1cf5   :  { %v1522_v21 = vpop.permute.xlu0 %1521 }
0x1cf6   :  { %v1524_v22 = vmul.f32 %v2625_v20, %v1522_v21  ;;  %v1839_v21 = vld [vmem:[#allocation2 + $0x1c] sm:$0xf] }
0x1cf8   :  { %1526 = vrot.lane.b32.xlu1 %v1524_v22, %s2715_s3 }
0x1d6a   :  { %v1527_v24 = vpop.permute.xlu1 %1526 }
0x1d6b   :  { %v1529_v25 = vadd.f32 %v1527_v24, %v1519_v23 }
0x1d6d   :  { %2626 = vtanh.f32 %v1529_v25 }
0x1d77   :  { %v2627_v26 = vpop.eup %2626 }
0x1d78   :  { %1532 = vrot.lane.b32.xlu0 %v2627_v26, %s2714_s14 }
0x1dea   :  { %v1533_v27 = vpop.permute.xlu0 %1532 }
0x1deb   :  { %v1535_v28 = vmul.f32 %v2625_v20, %v1533_v27 }
0x1ded   :  { %1538 = vrot.lane.b32.xlu1 %v1535_v28, %s2715_s3 }
0x1e5f   :  { %v1539_v30 = vpop.permute.xlu1 %1538 }
0x1e60   :  { %2359 = vmatmul.mubr.msk.f32.vlgmr.msra.gmra.mrb[16].mxu0 %vm68_vm1, %v1539_v30 }
0x1e61   :  { %2507 = vmatpush3.bf16.msra.mxu0 %v2958_v47  ;;  %2380 = vmatprep.mubr.msk.f32.mxu0 %vm2712_vm0, %v2713_v1 }
0x1e62   :  { %2508 = vmatprep.subr.bf16.mxu0 %v2711_v0 }
0x1e65   :  { %2510 = vmatpush3.bf16.msra.mxu0 %v2962_v50 }
0x1e66   :  { %2517 = vmatprep.subr.bf16.mxu0 %v2711_v0 }
0x1f33   :  { %v1608_v32 = vpop.f32.mrb[16].mxu0 }
0x1f34   :  { %v1612_v33 = vadd.f32 %v1608_v32, %v1536_v31  ;;  %v2360_v34 = vpop.f32.mrb[17].mxu0 }
0x1f36   :  { %2628 = vtanh.f32 %v1612_v33  ;;  %v2080_v36 = vmul.f32 -1.442695, %v1612_v33 }
0x1f38   :  { %2630 = vpow2.f32 %v2080_v36  ;;  %v1940_v36 = vld [vmem:[%s3108_s9] sm:$0xff] }
0x1f40   :  { %v2629_v35 = vpop.eup %2628 }
0x1f41   :  { %1622 = vrot.lane.b32.xlu0 %v2629_v35, %s2714_s14 }
0x1f42   :  { %v2631_v37 = vpop.eup %2630 }
0x1f43   :  { %v1616_v38 = vadd.f32 1.0, %v2631_v37  ;;  %v1941_v37 = vld [vmem:[%s3108_s9 + $0x8] sm:$0xff] }
0x1f45   :  { %2632 = vrcp.f32 %v1616_v38  ;;  %v1942_v38 = vld [vmem:[%s3108_s9 + $0x10] sm:$0xff] }
0x1f4f   :  { %v2633_v39 = vpop.eup %2632 }
0x1f50   :  { %v1620_v42 = vmul.f32 %v2633_v39, %v1529_v25 }
0x1fb3   :  { %v1623_v40 = vpop.permute.xlu0 %1622 }
0x1fb4   :  { %v1625_v41 = vmul.f32 %v2633_v39, %v1623_v40  ;;  %v1943_v40 = vld [vmem:[%s3108_s9 + $0x18] sm:$0xff]  ;;  %s2716_s9 = smov [#allocation7]  }
0x1fb5   :  { %s2034_s18 = sshll.u32 %s2716_s9, 4  ;;  %s2035_s18 = int_to_ptr.vmem [resolvable:$true] %s2034_s18 }
0x1fb6   :  { %1627 = vrot.lane.b32.xlu1 %v1625_v41, %s2715_s3  ;;  %v2521_v41 = vpack.c.bf16 %v1943_v40, %v1942_v38  ;;  %p2687_p9 = scmp.lt.s32.totalorder %s2035_s18, %s2035_s18 }
0x2028   :  { %v1628_v43 = vpop.permute.xlu1 %1627 }
0x2029   :  { %v1630_v44 = vadd.f32 %v1628_v43, %v1620_v42 }
0x202b   :  { %2634 = vtanh.f32 %v1630_v44 }
0x2035   :  { %v2635_v45 = vpop.eup %2634 }
0x2036   :  { %1633 = vrot.lane.b32.xlu0 %v2635_v45, %s2714_s14 }
0x20a8   :  { %v1634_v46 = vpop.permute.xlu0 %1633 }
0x20a9   :  { %v1636_v48 = vmul.f32 %v2633_v39, %v1634_v46  ;;  %v2518_v39 = vpack.c.bf16 %v1941_v37, %v1940_v36  ;;  %v2087_v46 = vld [vmem:[%s3109_s10] ss:$0 sm:$0xff] }
0x20ab   :  { %1639 = vrot.lane.b32.xlu1 %v1636_v48, %s2715_s3 }
0x211d   :  { %v1640_v29 = vpop.permute.xlu1 %1639 }
0x211e   :  { %2370 = vmatmul.mubr.msk.f32.vlgmr.msra.gmra.mrb[16].mxu1 %vm68_vm1, %v1640_v29 }
0x211f   :  { %2513 = vmatpush3.bf16.msra.mxu1 %v2958_v47  ;;  %2391 = vmatprep.mubr.msk.f32.mxu1 %vm2712_vm0, %v2713_v1 }
0x2120   :  { %2514 = vmatprep.subr.bf16.mxu1 %v2711_v0 }
0x2123   :  { %2516 = vmatpush3.bf16.msra.mxu1 %v2962_v50 }
0x21f1   :  { %v1709_v51 = vpop.f32.mrb[16].mxu1 }
0x21f2   :  { %v1713_v52 = vadd.f32 %v1709_v51, %v1637_v49  ;;  %v2371_v53 = vpop.f32.mrb[17].mxu1 }
0x21f4   :  { %2636 = vtanh.f32 %v1713_v52  ;;  %v2082_v55 = vmul.f32 -1.442695, %v1713_v52 }
0x21f6   :  { %2638 = vpow2.f32 %v2082_v55 }
0x21fe   :  { %v2637_v54 = vpop.eup %2636 }
0x21ff   :  { %1723 = vrot.lane.b32.xlu0 %v2637_v54, %s2714_s14 }
0x2200   :  { %v2639_v56 = vpop.eup %2638 }
0x2201   :  { %v1717_v57 = vadd.f32 1.0, %v2639_v56 }
0x2203   :  { %2640 = vrcp.f32 %v1717_v57 }
0x220d   :  { %v2641_v47 = vpop.eup %2640 }
0x220e   :  { %v1721_v60 = vmul.f32 %v2641_v47, %v1630_v44 }
0x2271   :  { %v1724_v58 = vpop.permute.xlu0 %1723 }
0x2272   :  { %v1726_v59 = vmul.f32 %v2641_v47, %v1724_v58 }
0x2274   :  { %1728 = vrot.lane.b32.xlu1 %v1726_v59, %s2715_s3 }
0x22e6   :  { %v1729_v50 = vpop.permute.xlu1 %1728 }
0x22e7   :  { %v1731_v61 = vadd.f32 %v1729_v50, %v1721_v60 }
0x22e9   :  { %2642 = vtanh.f32 %v1731_v61 }
0x22f3   :  { %v2643_v62 = vpop.eup %2642 }
0x22f4   :  { %1734 = vrot.lane.b32.xlu0 %v2643_v62, %s2714_s14 }
0x2366   :  { %v1735_v63 = vpop.permute.xlu0 %1734 }
0x2367   :  { %v1737_v2 = vmul.f32 %v2641_v47, %v1735_v63 }
0x2369   :  { %1740 = vrot.lane.b32.xlu1 %v1737_v2, %s2715_s3 }
0x23db   :  { %v1741_v3 = vpop.permute.xlu1 %1740 }
0x23dc   :  { %2381 = vmatmul.mubr.msk.f32.vlgmr.msra.gmra.mrb[18].mxu0 %vm68_vm1, %v1741_v3 }
0x23dd   :  { %2402 = vmatprep.mubr.msk.f32.mxu0 %vm2712_vm0, %v2713_v1  ;;  %2519 = vmatpush3.bf16.msra.mxu0 %v2518_v39 }
0x23de   :  { %2520 = vmatprep.subr.bf16.mxu0 %v2711_v0 }
0x23e1   :  { %2522 = vmatpush3.bf16.msra.mxu0 %v2521_v41 }
0x24af   :  { %v1810_v4 = vpop.f32.mrb[18].mxu0 }
0x24b0   :  { %v1814_v5 = vadd.f32 %v1810_v4, %v1738_v12  ;;  %v2382_v6 = vpop.f32.mrb[19].mxu0 }
0x24b2   :  { %2644 = vtanh.f32 %v1814_v5  ;;  %v2084_v14 = vmul.f32 -1.442695, %v1814_v5 }
0x24b4   :  { %2646 = vpow2.f32 %v2084_v14 }
0x24bc   :  { %v2645_v7 = vpop.eup %2644 }
0x24bd   :  { %1824 = vrot.lane.b32.xlu0 %v2645_v7, %s2714_s14 }
0x24be   :  { %v2647_v8 = vpop.eup %2646 }
0x24bf   :  { %v1818_v9 = vadd.f32 1.0, %v2647_v8 }
0x24c1   :  { %2648 = vrcp.f32 %v1818_v9 }
0x24cb   :  { %v2649_v10 = vpop.eup %2648 }
0x24cc   :  { %v1822_v15 = vmul.f32 %v2649_v10, %v1731_v61 }
0x252f   :  { %v1825_v11 = vpop.permute.xlu0 %1824 }
0x2530   :  { %v1827_v13 = vmul.f32 %v2649_v10, %v1825_v11 }
0x2532   :  { %1829 = vrot.lane.b32.xlu1 %v1827_v13, %s2715_s3 }
0x25a4   :  { %v1830_v1 = vpop.permute.xlu1 %1829 }
0x25a5   :  { %v1832_v16 = vadd.f32 %v1830_v1, %v1822_v15 }
0x25a7   :  { %2650 = vtanh.f32 %v1832_v16 }
0x25b1   :  { %v2651_v17 = vpop.eup %2650 }
0x25b2   :  { %1835 = vrot.lane.b32.xlu0 %v2651_v17, %s2714_s14 }
0x2624   :  { %v1836_v18 = vpop.permute.xlu0 %1835 }
0x2625   :  { %v1838_v19 = vmul.f32 %v2649_v10, %v1836_v18 }
0x2627   :  { %1841 = vrot.lane.b32.xlu1 %v1838_v19, %s2715_s3 }
0x2699   :  { %v1842_v20 = vpop.permute.xlu1 %1841 }
0x269a   :  { %2392 = vmatmul.mubr.msk.f32.vlgmr.msra.gmra.mrb[18].mxu1 %vm68_vm1, %v1842_v20 }
0x276d   :  { %v1911_v22 = vpop.f32.mrb[18].mxu1 }
0x276e   :  { %v1915_v23 = vadd.f32 %v1911_v22, %v1839_v21  ;;  %v2393_v24 = vpop.f32.mrb[19].mxu1 }
0x2770   :  { %2652 = vtanh.f32 %v1915_v23  ;;  %v2086_v26 = vmul.f32 -1.442695, %v1915_v23 }
0x2772   :  { %2654 = vpow2.f32 %v2086_v26 }
0x277a   :  { %v2653_v25 = vpop.eup %2652 }
0x277b   :  { %1925 = vrot.lane.b32.xlu0 %v2653_v25, %s2714_s14 }
0x277c   :  { %v2655_v27 = vpop.eup %2654 }
0x277d   :  { %v1919_v28 = vadd.f32 1.0, %v2655_v27 }
0x277f   :  { %2656 = vrcp.f32 %v1919_v28 }
0x2789   :  { %v2657_v30 = vpop.eup %2656 }
0x278a   :  { %v1923_v33 = vmul.f32 %v2657_v30, %v1832_v16 }
0x27ed   :  { %v1926_v31 = vpop.permute.xlu0 %1925 }
0x27ee   :  { %v1928_v32 = vmul.f32 %v2657_v30, %v1926_v31 }
0x27f0   :  { %1930 = vrot.lane.b32.xlu1 %v1928_v32, %s2715_s3 }
0x2862   :  { %v1931_v34 = vpop.permute.xlu1 %1930 }
0x2863   :  { %v1933_v35 = vadd.f32 %v1931_v34, %v1923_v33 }
0x2865   :  { %2658 = vtanh.f32 %v1933_v35 }
0x286f   :  { %v2659_v42 = vpop.eup %2658 }
0x2870   :  { %1936 = vrot.lane.b32.xlu0 %v2659_v42, %s2714_s14  ;;  %s2682_s14 = scalar_lea.vmem %s2035_s18, 64 }
0x2871   :  { %p2683_p8 = scmp.ne.s32.totalorder %s2035_s18, %s2682_s14  ;;  %p2688_p10 = scmp.lt.s32.totalorder %s2682_s14, %s2682_s14 }
0x2873   :  { %p2689_p11 = por %p2688_p10, %p2687_p9 }
0x2875   :  { %p2690_p12 = pnand %p2689_p11, %p2683_p8 }
0x28e2   :  { %v1937_v43 = vpop.permute.xlu0 %1936 }
0x28e3   :  { %v1939_v44 = vmul.f32 %v2657_v30, %v1937_v43 }
0x28e5   :  { %1952 = vrot.lane.b32.xlu1 %v1939_v44, %s2715_s3 }
0x2957   :  { %v1953_v45 = vpop.permute.xlu1 %1952 }
0x2958   :  { %2403 = vmatmul.mubr.msk.f32.vlgmr.msra.gmra.mrb[20].mxu0 %vm68_vm1, %v1953_v45 }
0x2a2b   :  { %v2022_v48 = vpop.f32.mrb[20].mxu0 }
0x2a2c   :  { %v2023_v0 = vadd.f32 %v2087_v46, %v2022_v48  ;;  %v2404_v29 = vpop.f32.mrb[21].mxu0 }
0x2a2e   :  { %2027 = vst.msk [vmem:[#allocation7] sm:$0xf] %vm2026_vm3, %v2023_v0 }
0x2a2f   :  { %2693 = shalt.err (!%p2690_p12)
}
0x2a30   :  { %s2694_s0 = scalar_lea.hbm %s3110_s11, 64 }
0x2a31   :  { %p2695_p13 = scmp.ne.s32.totalorder %s3110_s11, %s2694_s0  ;;  %p2698_p0 = scmp.lt.u32.totalorder %s2694_s0, %s3110_s11 }
0x2a33   :  { %p2700_p1 = pnand %p2698_p0, %p2695_p13 }
0x2a35   :  { %2703 = shalt.err (!%p2700_p1)
}
0x2a36   :  { %2037 = dma.vmem_to_hbm [thread:$0]  %s2035_s18, 64, %s3110_s11, [#allocation6]  }
0x2a37   :  { %2706 = dma.done.wait [#allocation6], 64  }
0x2a38   :  { %2707 = vsyncadd [#allocation6], 4294967232 }
0x2a39   :  { %2041 = vsyncpa [#allocation5], 1 }
0x2a3a   :  { %2042 = vsyncpa [#allocation6], 1 }

</bundles_post_ra>
